<compile_context>
chip_gen: v5e
topology: v5e:2x2
jax: 0.10.0
libtpu: 0.0.40
codegen_flags: <defaults>
</compile_context>

<pallas_src>
import functools

import jax
import jax.numpy as jnp
from jax import lax
from jax.experimental import pallas as pl
from jax.experimental.pallas import tpu as pltpu


# -----------------------------------------------------------------------------
# One-time parameter packing (outside the per-call path)
# -----------------------------------------------------------------------------
def pack_policy_params(params):
    """Pack all Policy parameters into one lane-dense f32 slab (rows, 4*H).

    Row layout (width = 4*H):
      [0      , S)       linear1 weight^T          (S, H)   cols [0, H)
      [S      , S+1)     linear1 bias              (1, H)   cols [0, H)
      [S+1    , S+1+H)   lstm W_ih^T  (g-cols x2)  (H, 4H)
      [S+1+H  , S+1+2H)  lstm W_hh^T  (g-cols x2)  (H, 4H)
      [S+1+2H , S+2+2H)  lstm b_ih+b_hh (g x2)     (1, 4H)
      [S+2+2H , S+2+3H)  linear2 weight^T          (H, A)   cols [0, A)
      [S+2+3H , S+3+3H)  linear2 bias              (1, A)   cols [0, A)

    The g-gate columns [2H, 3H) are pre-scaled by 2 so the kernel can compute
    tanh(x) as 2*sigmoid(2x) - 1, folding the g activation into the single
    sigmoid over all gates.
    """
    H, S = params["w1"].shape
    A = params["w2"].shape[0]
    WP = 4 * H
    gscale = jnp.ones((WP,), jnp.float32).at[2 * H:3 * H].set(2.0)

    w1t = params["w1"].T.astype(jnp.float32)                               # (S, H)
    b1 = params["b1"].reshape(1, H).astype(jnp.float32)                    # (1, H)
    wiht = params["w_ih"].T.astype(jnp.float32) * gscale                   # (H, 4H)
    whht = params["w_hh"].T.astype(jnp.float32) * gscale                   # (H, 4H)
    blstm = ((params["b_ih"] + params["b_hh"]).astype(jnp.float32)
             * gscale).reshape(1, WP)                                      # (1, 4H)
    w2t = params["w2"].T.astype(jnp.float32)                               # (H, A)
    b2 = params["b2"].reshape(1, A).astype(jnp.float32)                    # (1, A)

    def pad_w(a):
        return jnp.pad(a, ((0, 0), (0, WP - a.shape[1])))

    slab = jnp.concatenate(
        [pad_w(w1t), pad_w(b1), wiht, whht, blstm, pad_w(w2t), pad_w(b2)],
        axis=0)
    return slab  # (S + 3*H + 3, 4*H) float32


# -----------------------------------------------------------------------------
# Forward (single Pallas kernel; everything VMEM-resident)
# -----------------------------------------------------------------------------
@functools.partial(jax.jit, static_argnames=("action_space",))
def policy_forward(x, h, c, param_slab, action_space=2):
    T, B, S = x.shape
    H = h.shape[-1]
    A = action_space
    W_out = max(A, H)

    # Static row offsets into the parameter slab.
    r_w1 = 0
    r_b1 = S
    r_wih = S + 1
    r_whh = S + 1 + H
    r_bl = S + 1 + 2 * H
    r_w2 = S + 2 + 2 * H
    r_b2 = S + 2 + 3 * H

    def kernel(x_ref, h0_ref, c0_ref, p_ref, out_ref):
        # ---- linear1 + ReLU over all timesteps: (T*B, S) @ (S, H) ----
        x2 = x_ref[...].reshape(T * B, S)
        w1t = p_ref[r_w1:r_w1 + S, 0:H]
        b1 = p_ref[r_b1:r_b1 + 1, 0:H]
        x1 = jnp.maximum(
            jnp.dot(x2, w1t, preferred_element_type=jnp.float32) + b1, 0.0)

        # ---- hoisted LSTM input projection: one MXU matmul for all t ----
        wiht = p_ref[r_wih:r_wih + H, :]
        blstm = p_ref[r_bl:r_bl + 1, :]
        gates_x = (jnp.dot(x1, wiht, preferred_element_type=jnp.float32)
                   + blstm)                                      # (T*B, 4H)

        # W_hh^T rows held resident as (1, 4H) vregs; the recurrent projection
        # is H broadcast mul-adds on the VPU -> no MXU push/pop on the serial
        # chain. (hidden_space is 4 for this module, so this stays tiny.)
        whh_rows = [p_ref[r_whh + k:r_whh + k + 1, :] for k in range(H)]

        hcur = h0_ref[0]                                         # (B, H)
        ccur = c0_ref[0]                                         # (B, H)

        row_ids = lax.broadcasted_iota(jnp.int32, (T * B, 1), 0)
        h_seq = jnp.zeros((T * B, H), jnp.float32)

        # ---- LSTM recurrence (PyTorch gate order i, f, g, o), static unroll ----
        for t in range(T):                                       # T static
            gh = whh_rows[0] * hcur[:, 0:1]
            for k in range(1, H):
                gh = gh + whh_rows[k] * hcur[:, k:k + 1]
            gates = gates_x[t * B:(t + 1) * B, :] + gh           # (B, 4H)
            sig = jax.nn.sigmoid(gates)   # single EUP push: i, f, o exact;
                                          # g-cols were pre-scaled by 2
            i = sig[:, 0 * H:1 * H]
            f = sig[:, 1 * H:2 * H]
            o = sig[:, 3 * H:4 * H]
            g = 2.0 * sig[:, 2 * H:3 * H] - 1.0   # == tanh(g preactivation)
            ccur = f * ccur + i * g
            hcur = o * jnp.tanh(ccur)
            # In-loop write of row t of h_seq via iota mask (VPU select).
            if B == 1:
                h_seq = jnp.where(row_ids == t, hcur, h_seq)
            else:
                hrep = jnp.broadcast_to(hcur, (T, B, H)).reshape(T * B, H)
                h_seq = jnp.where((row_ids // B) == t, hrep, h_seq)

        # ---- linear2 + softmax over the action dim ----
        w2t = p_ref[r_w2:r_w2 + H, 0:A]
        b2 = p_ref[r_b2:r_b2 + 1, 0:A]
        logits = (jnp.dot(h_seq, w2t, preferred_element_type=jnp.float32)
                  + b2)                                          # (T*B, A)
        if A == 2:
            # 2-class softmax == sigmoid of the logit difference (no XLU reductions)
            d = logits[:, 0:1] - logits[:, 1:2]
            p0 = jax.nn.sigmoid(d)
            probs = jnp.concatenate([p0, 1.0 - p0], axis=1)
        else:
            m = jnp.max(logits, axis=-1, keepdims=True)
            e = jnp.exp(logits - m)
            probs = e * pl.reciprocal(jnp.sum(e, axis=-1, keepdims=True),
                                      approx=True)

        # ---- single merged output slab: [probs ; new_h ; new_c] -> 1 DMA ----
        out_ref[...] = jnp.zeros_like(out_ref)                   # deterministic padding
        out_ref[0:T * B, 0:A] = probs
        out_ref[T * B:T * B + B, 0:H] = hcur
        out_ref[T * B + B:T * B + 2 * B, 0:H] = ccur

    vmem = pl.BlockSpec(memory_space=pltpu.MemorySpace.VMEM)
    out = pl.pallas_call(
        kernel,
        out_shape=jax.ShapeDtypeStruct((T * B + 2 * B, W_out), jnp.float32),
        in_specs=[vmem, vmem, vmem, vmem],
        out_specs=vmem,
        cost_estimate=pl.CostEstimate(
            flops=16 * T * B * H * (S + 4 * H + A),
            transcendentals=8 * T * B * H,
            bytes_accessed=4 * ((T * B + 2 * B) * W_out
                                + T * B * S + 2 * B * H
                                + (S + 3 * H + 3) * 4 * H),
        ),
    )(x, h, c, param_slab)

    probs = out[0:T * B, 0:A].reshape(T, B, A)
    new_h = out[T * B:T * B + B, 0:H].reshape(1, B, H)
    new_c = out[T * B + B:T * B + 2 * B, 0:H].reshape(1, B, H)
    return probs, new_h, new_c


# -----------------------------------------------------------------------------
# Pure-JAX reference (mirrors PyTorch semantics exactly)
# -----------------------------------------------------------------------------
def policy_reference(x, h, c, params):
    T, B, S = x.shape
    H = params["w1"].shape[0]
    x1 = jnp.maximum(x @ params["w1"].T + params["b1"], 0.0)     # (T, B, H)

    def step(carry, x_t):
        h, c = carry
        gates = (x_t @ params["w_ih"].T + params["b_ih"]
                 + h @ params["w_hh"].T + params["b_hh"])
        i = jax.nn.sigmoid(gates[:, 0 * H:1 * H])
        f = jax.nn.sigmoid(gates[:, 1 * H:2 * H])
        g = jnp.tanh(gates[:, 2 * H:3 * H])
        o = jax.nn.sigmoid(gates[:, 3 * H:4 * H])
        c_new = f * c + i * g
        h_new = o * jnp.tanh(c_new)
        return (h_new, c_new), h_new

    (h_fin, c_fin), h_seq = lax.scan(step, (h[0], c[0]), x1)
    logits = h_seq @ params["w2"].T + params["b2"]               # (T, B, A)
    probs = jax.nn.softmax(logits, axis=2)
    return probs, h_fin[None], c_fin[None]


# -----------------------------------------------------------------------------
# Main
# -----------------------------------------------------------------------------
if __name__ == "__main__":
    # Module sizes: state_space=2, hidden_space=4, action_space=2
    S, H, A = 2, 4, 2
    T, B = 8, 1   # sequence length 8, batch 1 (matches init_hidden_state)

    key = jax.random.PRNGKey(0)
    ks = jax.random.split(key, 9)
    params = {
        "w1":   0.5 * jax.random.normal(ks[0], (H, S), jnp.float32),
        "b1":   0.1 * jax.random.normal(ks[1], (H,), jnp.float32),
        "w_ih": 0.5 * jax.random.normal(ks[2], (4 * H, H), jnp.float32),
        "w_hh": 0.5 * jax.random.normal(ks[3], (4 * H, H), jnp.float32),
        "b_ih": 0.1 * jax.random.normal(ks[4], (4 * H,), jnp.float32),
        "b_hh": 0.1 * jax.random.normal(ks[5], (4 * H,), jnp.float32),
        "w2":   0.5 * jax.random.normal(ks[6], (A, H), jnp.float32),
        "b2":   0.1 * jax.random.normal(ks[7], (A,), jnp.float32),
    }

    x = jax.random.normal(ks[8], (T, B, S), jnp.float32)
    h0 = jnp.zeros((1, B, H), jnp.float32)
    c0 = jnp.zeros((1, B, H), jnp.float32)

    # Parameter slab built once, outside the per-call path.
    param_slab = pack_policy_params(params)
    jax.block_until_ready(param_slab)

    probs, new_h, new_c = policy_forward(x, h0, c0, param_slab, action_space=A)
    jax.block_until_ready((probs, new_h, new_c))

    ref_probs, ref_h, ref_c = policy_reference(x, h0, c0, params)
    assert jnp.allclose(probs, ref_probs, atol=1e-5, rtol=1e-5)
    assert jnp.allclose(new_h, ref_h, atol=1e-5, rtol=1e-5)
    assert jnp.allclose(new_c, ref_c, atol=1e-5, rtol=1e-5)

    print("KERNEL_OK")
</pallas_src>

<mosaic_0001>
module attributes {stable_mosaic.version = 11 : i64} {
  func.func @kernel(%arg0: memref<8x1x2xf32, #tpu.memory_space<vmem>>, %arg1: memref<1x1x4xf32, #tpu.memory_space<vmem>>, %arg2: memref<1x1x4xf32, #tpu.memory_space<vmem>>, %arg3: memref<17x16xf32, #tpu.memory_space<vmem>>, %arg4: memref<10x4xf32, #tpu.memory_space<vmem>>) attributes {dimension_semantics = [], scalar_prefetch = 0 : i64, scratch_operands = 0 : i64, tpu.core_type = #tpu.core_type<tc>} {
    %c0 = arith.constant 0 : index
    %c0_0 = arith.constant 0 : index
    %c0_1 = arith.constant 0 : index
    %0 = vector.load %arg0[%c0, %c0_0, %c0_1] : memref<8x1x2xf32, #tpu.memory_space<vmem>>, vector<8x1x2xf32>
    %1 = vector.shape_cast %0 : vector<8x1x2xf32> to vector<8x2xf32>
    %c0_2 = arith.constant 0 : index
    %c0_3 = arith.constant 0 : index
    %2 = vector.load %arg3[%c0_2, %c0_3] : memref<17x16xf32, #tpu.memory_space<vmem>>, vector<2x4xf32>
    %c2 = arith.constant 2 : index
    %c0_4 = arith.constant 0 : index
    %3 = vector.load %arg3[%c2, %c0_4] : memref<17x16xf32, #tpu.memory_space<vmem>>, vector<1x4xf32>
    %cst = arith.constant dense<0.000000e+00> : vector<8x4xf32>
    %4 = tpu.matmul %1, %2, %cst {dimension_numbers = #tpu.dot_dimension_numbers<[1], [0], [0], [1], [0, 0, 1, 1], [], []>} : vector<8x2xf32>, vector<2x4xf32>, vector<8x4xf32> -> vector<8x4xf32>
    %5 = vector.broadcast %3 : vector<1x4xf32> to vector<8x4xf32>
    %6 = arith.addf %4, %5 : vector<8x4xf32>
    %cst_5 = arith.constant 0.000000e+00 : f32
    %7 = vector.broadcast %cst_5 : f32 to vector<8x4xf32>
    %8 = arith.maximumf %6, %7 : vector<8x4xf32>
    %c3 = arith.constant 3 : index
    %c0_6 = arith.constant 0 : index
    %9 = vector.load %arg3[%c3, %c0_6] : memref<17x16xf32, #tpu.memory_space<vmem>>, vector<4x16xf32>
    %c11 = arith.constant 11 : index
    %c0_7 = arith.constant 0 : index
    %10 = vector.load %arg3[%c11, %c0_7] : memref<17x16xf32, #tpu.memory_space<vmem>>, vector<1x16xf32>
    %cst_8 = arith.constant dense<0.000000e+00> : vector<8x16xf32>
    %11 = tpu.matmul %8, %9, %cst_8 {dimension_numbers = #tpu.dot_dimension_numbers<[1], [0], [0], [1], [0, 0, 1, 1], [], []>} : vector<8x4xf32>, vector<4x16xf32>, vector<8x16xf32> -> vector<8x16xf32>
    %12 = vector.broadcast %10 : vector<1x16xf32> to vector<8x16xf32>
    %13 = arith.addf %11, %12 : vector<8x16xf32>
    %c7 = arith.constant 7 : index
    %c0_9 = arith.constant 0 : index
    %14 = vector.load %arg3[%c7, %c0_9] : memref<17x16xf32, #tpu.memory_space<vmem>>, vector<1x16xf32>
    %c8 = arith.constant 8 : index
    %c0_10 = arith.constant 0 : index
    %15 = vector.load %arg3[%c8, %c0_10] : memref<17x16xf32, #tpu.memory_space<vmem>>, vector<1x16xf32>
    %c9 = arith.constant 9 : index
    %c0_11 = arith.constant 0 : index
    %16 = vector.load %arg3[%c9, %c0_11] : memref<17x16xf32, #tpu.memory_space<vmem>>, vector<1x16xf32>
    %c10 = arith.constant 10 : index
    %c0_12 = arith.constant 0 : index
    %17 = vector.load %arg3[%c10, %c0_12] : memref<17x16xf32, #tpu.memory_space<vmem>>, vector<1x16xf32>
    %c0_13 = arith.constant 0 : index
    %c0_14 = arith.constant 0 : index
    %c0_15 = arith.constant 0 : index
    %18 = vector.load %arg1[%c0_13, %c0_14, %c0_15] : memref<1x1x4xf32, #tpu.memory_space<vmem>>, vector<1x1x4xf32>
    %19 = vector.shape_cast %18 : vector<1x1x4xf32> to vector<1x4xf32>
    %c0_16 = arith.constant 0 : index
    %c0_17 = arith.constant 0 : index
    %c0_18 = arith.constant 0 : index
    %20 = vector.load %arg2[%c0_16, %c0_17, %c0_18] : memref<1x1x4xf32, #tpu.memory_space<vmem>>, vector<1x1x4xf32>
    %21 = vector.shape_cast %20 : vector<1x1x4xf32> to vector<1x4xf32>
    %22 = tpu.iota {dimensions = array<i32: 0>} : vector<8x1xi32>
    %cst_19 = arith.constant 0.000000e+00 : f32
    %23 = vector.broadcast %cst_19 : f32 to vector<8x4xf32>
    %24 = vector.extract_strided_slice %19 {offsets = [0, 0], sizes = [1, 1], strides = [1, 1]} : vector<1x4xf32> to vector<1x1xf32>
    %25 = vector.broadcast %24 : vector<1x1xf32> to vector<1x16xf32>
    %26 = arith.mulf %14, %25 : vector<1x16xf32>
    %27 = vector.extract_strided_slice %19 {offsets = [0, 1], sizes = [1, 1], strides = [1, 1]} : vector<1x4xf32> to vector<1x1xf32>
    %28 = vector.broadcast %27 : vector<1x1xf32> to vector<1x16xf32>
    %29 = arith.mulf %15, %28 : vector<1x16xf32>
    %30 = arith.addf %26, %29 : vector<1x16xf32>
    %31 = vector.extract_strided_slice %19 {offsets = [0, 2], sizes = [1, 1], strides = [1, 1]} : vector<1x4xf32> to vector<1x1xf32>
    %32 = vector.broadcast %31 : vector<1x1xf32> to vector<1x16xf32>
    %33 = arith.mulf %16, %32 : vector<1x16xf32>
    %34 = arith.addf %30, %33 : vector<1x16xf32>
    %35 = vector.extract_strided_slice %19 {offsets = [0, 3], sizes = [1, 1], strides = [1, 1]} : vector<1x4xf32> to vector<1x1xf32>
    %36 = vector.broadcast %35 : vector<1x1xf32> to vector<1x16xf32>
    %37 = arith.mulf %17, %36 : vector<1x16xf32>
    %38 = arith.addf %34, %37 : vector<1x16xf32>
    %39 = vector.extract_strided_slice %13 {offsets = [0, 0], sizes = [1, 16], strides = [1, 1]} : vector<8x16xf32> to vector<1x16xf32>
    %40 = arith.addf %39, %38 : vector<1x16xf32>
    %41 = arith.negf %40 : vector<1x16xf32>
    %42 = math.exp %41 : vector<1x16xf32>
    %cst_20 = arith.constant 1.000000e+00 : f32
    %43 = vector.broadcast %cst_20 : f32 to vector<1x16xf32>
    %44 = arith.addf %43, %42 : vector<1x16xf32>
    %45 = arith.divf %43, %44 : vector<1x16xf32>
    %46 = vector.extract_strided_slice %45 {offsets = [0, 0], sizes = [1, 4], strides = [1, 1]} : vector<1x16xf32> to vector<1x4xf32>
    %47 = vector.extract_strided_slice %45 {offsets = [0, 4], sizes = [1, 4], strides = [1, 1]} : vector<1x16xf32> to vector<1x4xf32>
    %48 = vector.extract_strided_slice %45 {offsets = [0, 12], sizes = [1, 4], strides = [1, 1]} : vector<1x16xf32> to vector<1x4xf32>
    %49 = vector.extract_strided_slice %45 {offsets = [0, 8], sizes = [1, 4], strides = [1, 1]} : vector<1x16xf32> to vector<1x4xf32>
    %cst_21 = arith.constant 2.000000e+00 : f32
    %50 = vector.broadcast %cst_21 : f32 to vector<1x4xf32>
    %51 = arith.mulf %50, %49 : vector<1x4xf32>
    %cst_22 = arith.constant 1.000000e+00 : f32
    %52 = vector.broadcast %cst_22 : f32 to vector<1x4xf32>
    %53 = arith.subf %51, %52 : vector<1x4xf32>
    %54 = arith.mulf %47, %21 : vector<1x4xf32>
    %55 = arith.mulf %46, %53 : vector<1x4xf32>
    %56 = arith.addf %54, %55 : vector<1x4xf32>
    %57 = math.tanh %56 : vector<1x4xf32>
    %58 = arith.mulf %48, %57 : vector<1x4xf32>
    %c0_i32 = arith.constant 0 : i32
    %59 = vector.broadcast %c0_i32 : i32 to vector<8x1xi32>
    %60 = arith.cmpi eq, %22, %59 : vector<8x1xi32>
    %61 = vector.shape_cast %60 : vector<8x1xi1> to vector<8x1xi1>
    %62 = vector.broadcast %61 : vector<8x1xi1> to vector<8x4xi1>
    %63 = vector.shape_cast %58 : vector<1x4xf32> to vector<1x4xf32>
    %64 = vector.broadcast %63 : vector<1x4xf32> to vector<8x4xf32>
    %65 = arith.select %62, %64, %23 : vector<8x4xi1>, vector<8x4xf32>
    %66 = vector.extract_strided_slice %58 {offsets = [0, 0], sizes = [1, 1], strides = [1, 1]} : vector<1x4xf32> to vector<1x1xf32>
    %67 = vector.broadcast %66 : vector<1x1xf32> to vector<1x16xf32>
    %68 = arith.mulf %14, %67 : vector<1x16xf32>
    %69 = vector.extract_strided_slice %58 {offsets = [0, 1], sizes = [1, 1], strides = [1, 1]} : vector<1x4xf32> to vector<1x1xf32>
    %70 = vector.broadcast %69 : vector<1x1xf32> to vector<1x16xf32>
    %71 = arith.mulf %15, %70 : vector<1x16xf32>
    %72 = arith.addf %68, %71 : vector<1x16xf32>
    %73 = vector.extract_strided_slice %58 {offsets = [0, 2], sizes = [1, 1], strides = [1, 1]} : vector<1x4xf32> to vector<1x1xf32>
    %74 = vector.broadcast %73 : vector<1x1xf32> to vector<1x16xf32>
    %75 = arith.mulf %16, %74 : vector<1x16xf32>
    %76 = arith.addf %72, %75 : vector<1x16xf32>
    %77 = vector.extract_strided_slice %58 {offsets = [0, 3], sizes = [1, 1], strides = [1, 1]} : vector<1x4xf32> to vector<1x1xf32>
    %78 = vector.broadcast %77 : vector<1x1xf32> to vector<1x16xf32>
    %79 = arith.mulf %17, %78 : vector<1x16xf32>
    %80 = arith.addf %76, %79 : vector<1x16xf32>
    %81 = vector.extract_strided_slice %13 {offsets = [1, 0], sizes = [1, 16], strides = [1, 1]} : vector<8x16xf32> to vector<1x16xf32>
    %82 = arith.addf %81, %80 : vector<1x16xf32>
    %83 = arith.negf %82 : vector<1x16xf32>
    %84 = math.exp %83 : vector<1x16xf32>
    %cst_23 = arith.constant 1.000000e+00 : f32
    %85 = vector.broadcast %cst_23 : f32 to vector<1x16xf32>
    %86 = arith.addf %85, %84 : vector<1x16xf32>
    %87 = arith.divf %85, %86 : vector<1x16xf32>
    %88 = vector.extract_strided_slice %87 {offsets = [0, 0], sizes = [1, 4], strides = [1, 1]} : vector<1x16xf32> to vector<1x4xf32>
    %89 = vector.extract_strided_slice %87 {offsets = [0, 4], sizes = [1, 4], strides = [1, 1]} : vector<1x16xf32> to vector<1x4xf32>
    %90 = vector.extract_strided_slice %87 {offsets = [0, 12], sizes = [1, 4], strides = [1, 1]} : vector<1x16xf32> to vector<1x4xf32>
    %91 = vector.extract_strided_slice %87 {offsets = [0, 8], sizes = [1, 4], strides = [1, 1]} : vector<1x16xf32> to vector<1x4xf32>
    %cst_24 = arith.constant 2.000000e+00 : f32
    %92 = vector.broadcast %cst_24 : f32 to vector<1x4xf32>
    %93 = arith.mulf %92, %91 : vector<1x4xf32>
    %cst_25 = arith.constant 1.000000e+00 : f32
    %94 = vector.broadcast %cst_25 : f32 to vector<1x4xf32>
    %95 = arith.subf %93, %94 : vector<1x4xf32>
    %96 = arith.mulf %89, %56 : vector<1x4xf32>
    %97 = arith.mulf %88, %95 : vector<1x4xf32>
    %98 = arith.addf %96, %97 : vector<1x4xf32>
    %99 = math.tanh %98 : vector<1x4xf32>
    %100 = arith.mulf %90, %99 : vector<1x4xf32>
    %c1_i32 = arith.constant 1 : i32
    %101 = vector.broadcast %c1_i32 : i32 to vector<8x1xi32>
    %102 = arith.cmpi eq, %22, %101 : vector<8x1xi32>
    %103 = vector.shape_cast %102 : vector<8x1xi1> to vector<8x1xi1>
    %104 = vector.broadcast %103 : vector<8x1xi1> to vector<8x4xi1>
    %105 = vector.shape_cast %100 : vector<1x4xf32> to vector<1x4xf32>
    %106 = vector.broadcast %105 : vector<1x4xf32> to vector<8x4xf32>
    %107 = arith.select %104, %106, %65 : vector<8x4xi1>, vector<8x4xf32>
    %108 = vector.extract_strided_slice %100 {offsets = [0, 0], sizes = [1, 1], strides = [1, 1]} : vector<1x4xf32> to vector<1x1xf32>
    %109 = vector.broadcast %108 : vector<1x1xf32> to vector<1x16xf32>
    %110 = arith.mulf %14, %109 : vector<1x16xf32>
    %111 = vector.extract_strided_slice %100 {offsets = [0, 1], sizes = [1, 1], strides = [1, 1]} : vector<1x4xf32> to vector<1x1xf32>
    %112 = vector.broadcast %111 : vector<1x1xf32> to vector<1x16xf32>
    %113 = arith.mulf %15, %112 : vector<1x16xf32>
    %114 = arith.addf %110, %113 : vector<1x16xf32>
    %115 = vector.extract_strided_slice %100 {offsets = [0, 2], sizes = [1, 1], strides = [1, 1]} : vector<1x4xf32> to vector<1x1xf32>
    %116 = vector.broadcast %115 : vector<1x1xf32> to vector<1x16xf32>
    %117 = arith.mulf %16, %116 : vector<1x16xf32>
    %118 = arith.addf %114, %117 : vector<1x16xf32>
    %119 = vector.extract_strided_slice %100 {offsets = [0, 3], sizes = [1, 1], strides = [1, 1]} : vector<1x4xf32> to vector<1x1xf32>
    %120 = vector.broadcast %119 : vector<1x1xf32> to vector<1x16xf32>
    %121 = arith.mulf %17, %120 : vector<1x16xf32>
    %122 = arith.addf %118, %121 : vector<1x16xf32>
    %123 = vector.extract_strided_slice %13 {offsets = [2, 0], sizes = [1, 16], strides = [1, 1]} : vector<8x16xf32> to vector<1x16xf32>
    %124 = arith.addf %123, %122 : vector<1x16xf32>
    %125 = arith.negf %124 : vector<1x16xf32>
    %126 = math.exp %125 : vector<1x16xf32>
    %cst_26 = arith.constant 1.000000e+00 : f32
    %127 = vector.broadcast %cst_26 : f32 to vector<1x16xf32>
    %128 = arith.addf %127, %126 : vector<1x16xf32>
    %129 = arith.divf %127, %128 : vector<1x16xf32>
    %130 = vector.extract_strided_slice %129 {offsets = [0, 0], sizes = [1, 4], strides = [1, 1]} : vector<1x16xf32> to vector<1x4xf32>
    %131 = vector.extract_strided_slice %129 {offsets = [0, 4], sizes = [1, 4], strides = [1, 1]} : vector<1x16xf32> to vector<1x4xf32>
    %132 = vector.extract_strided_slice %129 {offsets = [0, 12], sizes = [1, 4], strides = [1, 1]} : vector<1x16xf32> to vector<1x4xf32>
    %133 = vector.extract_strided_slice %129 {offsets = [0, 8], sizes = [1, 4], strides = [1, 1]} : vector<1x16xf32> to vector<1x4xf32>
    %cst_27 = arith.constant 2.000000e+00 : f32
    %134 = vector.broadcast %cst_27 : f32 to vector<1x4xf32>
    %135 = arith.mulf %134, %133 : vector<1x4xf32>
    %cst_28 = arith.constant 1.000000e+00 : f32
    %136 = vector.broadcast %cst_28 : f32 to vector<1x4xf32>
    %137 = arith.subf %135, %136 : vector<1x4xf32>
    %138 = arith.mulf %131, %98 : vector<1x4xf32>
    %139 = arith.mulf %130, %137 : vector<1x4xf32>
    %140 = arith.addf %138, %139 : vector<1x4xf32>
    %141 = math.tanh %140 : vector<1x4xf32>
    %142 = arith.mulf %132, %141 : vector<1x4xf32>
    %c2_i32 = arith.constant 2 : i32
    %143 = vector.broadcast %c2_i32 : i32 to vector<8x1xi32>
    %144 = arith.cmpi eq, %22, %143 : vector<8x1xi32>
    %145 = vector.shape_cast %144 : vector<8x1xi1> to vector<8x1xi1>
    %146 = vector.broadcast %145 : vector<8x1xi1> to vector<8x4xi1>
    %147 = vector.shape_cast %142 : vector<1x4xf32> to vector<1x4xf32>
    %148 = vector.broadcast %147 : vector<1x4xf32> to vector<8x4xf32>
    %149 = arith.select %146, %148, %107 : vector<8x4xi1>, vector<8x4xf32>
    %150 = vector.extract_strided_slice %142 {offsets = [0, 0], sizes = [1, 1], strides = [1, 1]} : vector<1x4xf32> to vector<1x1xf32>
    %151 = vector.broadcast %150 : vector<1x1xf32> to vector<1x16xf32>
    %152 = arith.mulf %14, %151 : vector<1x16xf32>
    %153 = vector.extract_strided_slice %142 {offsets = [0, 1], sizes = [1, 1], strides = [1, 1]} : vector<1x4xf32> to vector<1x1xf32>
    %154 = vector.broadcast %153 : vector<1x1xf32> to vector<1x16xf32>
    %155 = arith.mulf %15, %154 : vector<1x16xf32>
    %156 = arith.addf %152, %155 : vector<1x16xf32>
    %157 = vector.extract_strided_slice %142 {offsets = [0, 2], sizes = [1, 1], strides = [1, 1]} : vector<1x4xf32> to vector<1x1xf32>
    %158 = vector.broadcast %157 : vector<1x1xf32> to vector<1x16xf32>
    %159 = arith.mulf %16, %158 : vector<1x16xf32>
    %160 = arith.addf %156, %159 : vector<1x16xf32>
    %161 = vector.extract_strided_slice %142 {offsets = [0, 3], sizes = [1, 1], strides = [1, 1]} : vector<1x4xf32> to vector<1x1xf32>
    %162 = vector.broadcast %161 : vector<1x1xf32> to vector<1x16xf32>
    %163 = arith.mulf %17, %162 : vector<1x16xf32>
    %164 = arith.addf %160, %163 : vector<1x16xf32>
    %165 = vector.extract_strided_slice %13 {offsets = [3, 0], sizes = [1, 16], strides = [1, 1]} : vector<8x16xf32> to vector<1x16xf32>
    %166 = arith.addf %165, %164 : vector<1x16xf32>
    %167 = arith.negf %166 : vector<1x16xf32>
    %168 = math.exp %167 : vector<1x16xf32>
    %cst_29 = arith.constant 1.000000e+00 : f32
    %169 = vector.broadcast %cst_29 : f32 to vector<1x16xf32>
    %170 = arith.addf %169, %168 : vector<1x16xf32>
    %171 = arith.divf %169, %170 : vector<1x16xf32>
    %172 = vector.extract_strided_slice %171 {offsets = [0, 0], sizes = [1, 4], strides = [1, 1]} : vector<1x16xf32> to vector<1x4xf32>
    %173 = vector.extract_strided_slice %171 {offsets = [0, 4], sizes = [1, 4], strides = [1, 1]} : vector<1x16xf32> to vector<1x4xf32>
    %174 = vector.extract_strided_slice %171 {offsets = [0, 12], sizes = [1, 4], strides = [1, 1]} : vector<1x16xf32> to vector<1x4xf32>
    %175 = vector.extract_strided_slice %171 {offsets = [0, 8], sizes = [1, 4], strides = [1, 1]} : vector<1x16xf32> to vector<1x4xf32>
    %cst_30 = arith.constant 2.000000e+00 : f32
    %176 = vector.broadcast %cst_30 : f32 to vector<1x4xf32>
    %177 = arith.mulf %176, %175 : vector<1x4xf32>
    %cst_31 = arith.constant 1.000000e+00 : f32
    %178 = vector.broadcast %cst_31 : f32 to vector<1x4xf32>
    %179 = arith.subf %177, %178 : vector<1x4xf32>
    %180 = arith.mulf %173, %140 : vector<1x4xf32>
    %181 = arith.mulf %172, %179 : vector<1x4xf32>
    %182 = arith.addf %180, %181 : vector<1x4xf32>
    %183 = math.tanh %182 : vector<1x4xf32>
    %184 = arith.mulf %174, %183 : vector<1x4xf32>
    %c3_i32 = arith.constant 3 : i32
    %185 = vector.broadcast %c3_i32 : i32 to vector<8x1xi32>
    %186 = arith.cmpi eq, %22, %185 : vector<8x1xi32>
    %187 = vector.shape_cast %186 : vector<8x1xi1> to vector<8x1xi1>
    %188 = vector.broadcast %187 : vector<8x1xi1> to vector<8x4xi1>
    %189 = vector.shape_cast %184 : vector<1x4xf32> to vector<1x4xf32>
    %190 = vector.broadcast %189 : vector<1x4xf32> to vector<8x4xf32>
    %191 = arith.select %188, %190, %149 : vector<8x4xi1>, vector<8x4xf32>
    %192 = vector.extract_strided_slice %184 {offsets = [0, 0], sizes = [1, 1], strides = [1, 1]} : vector<1x4xf32> to vector<1x1xf32>
    %193 = vector.broadcast %192 : vector<1x1xf32> to vector<1x16xf32>
    %194 = arith.mulf %14, %193 : vector<1x16xf32>
    %195 = vector.extract_strided_slice %184 {offsets = [0, 1], sizes = [1, 1], strides = [1, 1]} : vector<1x4xf32> to vector<1x1xf32>
    %196 = vector.broadcast %195 : vector<1x1xf32> to vector<1x16xf32>
    %197 = arith.mulf %15, %196 : vector<1x16xf32>
    %198 = arith.addf %194, %197 : vector<1x16xf32>
    %199 = vector.extract_strided_slice %184 {offsets = [0, 2], sizes = [1, 1], strides = [1, 1]} : vector<1x4xf32> to vector<1x1xf32>
    %200 = vector.broadcast %199 : vector<1x1xf32> to vector<1x16xf32>
    %201 = arith.mulf %16, %200 : vector<1x16xf32>
    %202 = arith.addf %198, %201 : vector<1x16xf32>
    %203 = vector.extract_strided_slice %184 {offsets = [0, 3], sizes = [1, 1], strides = [1, 1]} : vector<1x4xf32> to vector<1x1xf32>
    %204 = vector.broadcast %203 : vector<1x1xf32> to vector<1x16xf32>
    %205 = arith.mulf %17, %204 : vector<1x16xf32>
    %206 = arith.addf %202, %205 : vector<1x16xf32>
    %207 = vector.extract_strided_slice %13 {offsets = [4, 0], sizes = [1, 16], strides = [1, 1]} : vector<8x16xf32> to vector<1x16xf32>
    %208 = arith.addf %207, %206 : vector<1x16xf32>
    %209 = arith.negf %208 : vector<1x16xf32>
    %210 = math.exp %209 : vector<1x16xf32>
    %cst_32 = arith.constant 1.000000e+00 : f32
    %211 = vector.broadcast %cst_32 : f32 to vector<1x16xf32>
    %212 = arith.addf %211, %210 : vector<1x16xf32>
    %213 = arith.divf %211, %212 : vector<1x16xf32>
    %214 = vector.extract_strided_slice %213 {offsets = [0, 0], sizes = [1, 4], strides = [1, 1]} : vector<1x16xf32> to vector<1x4xf32>
    %215 = vector.extract_strided_slice %213 {offsets = [0, 4], sizes = [1, 4], strides = [1, 1]} : vector<1x16xf32> to vector<1x4xf32>
    %216 = vector.extract_strided_slice %213 {offsets = [0, 12], sizes = [1, 4], strides = [1, 1]} : vector<1x16xf32> to vector<1x4xf32>
    %217 = vector.extract_strided_slice %213 {offsets = [0, 8], sizes = [1, 4], strides = [1, 1]} : vector<1x16xf32> to vector<1x4xf32>
    %cst_33 = arith.constant 2.000000e+00 : f32
    %218 = vector.broadcast %cst_33 : f32 to vector<1x4xf32>
    %219 = arith.mulf %218, %217 : vector<1x4xf32>
    %cst_34 = arith.constant 1.000000e+00 : f32
    %220 = vector.broadcast %cst_34 : f32 to vector<1x4xf32>
    %221 = arith.subf %219, %220 : vector<1x4xf32>
    %222 = arith.mulf %215, %182 : vector<1x4xf32>
    %223 = arith.mulf %214, %221 : vector<1x4xf32>
    %224 = arith.addf %222, %223 : vector<1x4xf32>
    %225 = math.tanh %224 : vector<1x4xf32>
    %226 = arith.mulf %216, %225 : vector<1x4xf32>
    %c4_i32 = arith.constant 4 : i32
    %227 = vector.broadcast %c4_i32 : i32 to vector<8x1xi32>
    %228 = arith.cmpi eq, %22, %227 : vector<8x1xi32>
    %229 = vector.shape_cast %228 : vector<8x1xi1> to vector<8x1xi1>
    %230 = vector.broadcast %229 : vector<8x1xi1> to vector<8x4xi1>
    %231 = vector.shape_cast %226 : vector<1x4xf32> to vector<1x4xf32>
    %232 = vector.broadcast %231 : vector<1x4xf32> to vector<8x4xf32>
    %233 = arith.select %230, %232, %191 : vector<8x4xi1>, vector<8x4xf32>
    %234 = vector.extract_strided_slice %226 {offsets = [0, 0], sizes = [1, 1], strides = [1, 1]} : vector<1x4xf32> to vector<1x1xf32>
    %235 = vector.broadcast %234 : vector<1x1xf32> to vector<1x16xf32>
    %236 = arith.mulf %14, %235 : vector<1x16xf32>
    %237 = vector.extract_strided_slice %226 {offsets = [0, 1], sizes = [1, 1], strides = [1, 1]} : vector<1x4xf32> to vector<1x1xf32>
    %238 = vector.broadcast %237 : vector<1x1xf32> to vector<1x16xf32>
    %239 = arith.mulf %15, %238 : vector<1x16xf32>
    %240 = arith.addf %236, %239 : vector<1x16xf32>
    %241 = vector.extract_strided_slice %226 {offsets = [0, 2], sizes = [1, 1], strides = [1, 1]} : vector<1x4xf32> to vector<1x1xf32>
    %242 = vector.broadcast %241 : vector<1x1xf32> to vector<1x16xf32>
    %243 = arith.mulf %16, %242 : vector<1x16xf32>
    %244 = arith.addf %240, %243 : vector<1x16xf32>
    %245 = vector.extract_strided_slice %226 {offsets = [0, 3], sizes = [1, 1], strides = [1, 1]} : vector<1x4xf32> to vector<1x1xf32>
    %246 = vector.broadcast %245 : vector<1x1xf32> to vector<1x16xf32>
    %247 = arith.mulf %17, %246 : vector<1x16xf32>
    %248 = arith.addf %244, %247 : vector<1x16xf32>
    %249 = vector.extract_strided_slice %13 {offsets = [5, 0], sizes = [1, 16], strides = [1, 1]} : vector<8x16xf32> to vector<1x16xf32>
    %250 = arith.addf %249, %248 : vector<1x16xf32>
    %251 = arith.negf %250 : vector<1x16xf32>
    %252 = math.exp %251 : vector<1x16xf32>
    %cst_35 = arith.constant 1.000000e+00 : f32
    %253 = vector.broadcast %cst_35 : f32 to vector<1x16xf32>
    %254 = arith.addf %253, %252 : vector<1x16xf32>
    %255 = arith.divf %253, %254 : vector<1x16xf32>
    %256 = vector.extract_strided_slice %255 {offsets = [0, 0], sizes = [1, 4], strides = [1, 1]} : vector<1x16xf32> to vector<1x4xf32>
    %257 = vector.extract_strided_slice %255 {offsets = [0, 4], sizes = [1, 4], strides = [1, 1]} : vector<1x16xf32> to vector<1x4xf32>
    %258 = vector.extract_strided_slice %255 {offsets = [0, 12], sizes = [1, 4], strides = [1, 1]} : vector<1x16xf32> to vector<1x4xf32>
    %259 = vector.extract_strided_slice %255 {offsets = [0, 8], sizes = [1, 4], strides = [1, 1]} : vector<1x16xf32> to vector<1x4xf32>
    %cst_36 = arith.constant 2.000000e+00 : f32
    %260 = vector.broadcast %cst_36 : f32 to vector<1x4xf32>
    %261 = arith.mulf %260, %259 : vector<1x4xf32>
    %cst_37 = arith.constant 1.000000e+00 : f32
    %262 = vector.broadcast %cst_37 : f32 to vector<1x4xf32>
    %263 = arith.subf %261, %262 : vector<1x4xf32>
    %264 = arith.mulf %257, %224 : vector<1x4xf32>
    %265 = arith.mulf %256, %263 : vector<1x4xf32>
    %266 = arith.addf %264, %265 : vector<1x4xf32>
    %267 = math.tanh %266 : vector<1x4xf32>
    %268 = arith.mulf %258, %267 : vector<1x4xf32>
    %c5_i32 = arith.constant 5 : i32
    %269 = vector.broadcast %c5_i32 : i32 to vector<8x1xi32>
    %270 = arith.cmpi eq, %22, %269 : vector<8x1xi32>
    %271 = vector.shape_cast %270 : vector<8x1xi1> to vector<8x1xi1>
    %272 = vector.broadcast %271 : vector<8x1xi1> to vector<8x4xi1>
    %273 = vector.shape_cast %268 : vector<1x4xf32> to vector<1x4xf32>
    %274 = vector.broadcast %273 : vector<1x4xf32> to vector<8x4xf32>
    %275 = arith.select %272, %274, %233 : vector<8x4xi1>, vector<8x4xf32>
    %276 = vector.extract_strided_slice %268 {offsets = [0, 0], sizes = [1, 1], strides = [1, 1]} : vector<1x4xf32> to vector<1x1xf32>
    %277 = vector.broadcast %276 : vector<1x1xf32> to vector<1x16xf32>
    %278 = arith.mulf %14, %277 : vector<1x16xf32>
    %279 = vector.extract_strided_slice %268 {offsets = [0, 1], sizes = [1, 1], strides = [1, 1]} : vector<1x4xf32> to vector<1x1xf32>
    %280 = vector.broadcast %279 : vector<1x1xf32> to vector<1x16xf32>
    %281 = arith.mulf %15, %280 : vector<1x16xf32>
    %282 = arith.addf %278, %281 : vector<1x16xf32>
    %283 = vector.extract_strided_slice %268 {offsets = [0, 2], sizes = [1, 1], strides = [1, 1]} : vector<1x4xf32> to vector<1x1xf32>
    %284 = vector.broadcast %283 : vector<1x1xf32> to vector<1x16xf32>
    %285 = arith.mulf %16, %284 : vector<1x16xf32>
    %286 = arith.addf %282, %285 : vector<1x16xf32>
    %287 = vector.extract_strided_slice %268 {offsets = [0, 3], sizes = [1, 1], strides = [1, 1]} : vector<1x4xf32> to vector<1x1xf32>
    %288 = vector.broadcast %287 : vector<1x1xf32> to vector<1x16xf32>
    %289 = arith.mulf %17, %288 : vector<1x16xf32>
    %290 = arith.addf %286, %289 : vector<1x16xf32>
    %291 = vector.extract_strided_slice %13 {offsets = [6, 0], sizes = [1, 16], strides = [1, 1]} : vector<8x16xf32> to vector<1x16xf32>
    %292 = arith.addf %291, %290 : vector<1x16xf32>
    %293 = arith.negf %292 : vector<1x16xf32>
    %294 = math.exp %293 : vector<1x16xf32>
    %cst_38 = arith.constant 1.000000e+00 : f32
    %295 = vector.broadcast %cst_38 : f32 to vector<1x16xf32>
    %296 = arith.addf %295, %294 : vector<1x16xf32>
    %297 = arith.divf %295, %296 : vector<1x16xf32>
    %298 = vector.extract_strided_slice %297 {offsets = [0, 0], sizes = [1, 4], strides = [1, 1]} : vector<1x16xf32> to vector<1x4xf32>
    %299 = vector.extract_strided_slice %297 {offsets = [0, 4], sizes = [1, 4], strides = [1, 1]} : vector<1x16xf32> to vector<1x4xf32>
    %300 = vector.extract_strided_slice %297 {offsets = [0, 12], sizes = [1, 4], strides = [1, 1]} : vector<1x16xf32> to vector<1x4xf32>
    %301 = vector.extract_strided_slice %297 {offsets = [0, 8], sizes = [1, 4], strides = [1, 1]} : vector<1x16xf32> to vector<1x4xf32>
    %cst_39 = arith.constant 2.000000e+00 : f32
    %302 = vector.broadcast %cst_39 : f32 to vector<1x4xf32>
    %303 = arith.mulf %302, %301 : vector<1x4xf32>
    %cst_40 = arith.constant 1.000000e+00 : f32
    %304 = vector.broadcast %cst_40 : f32 to vector<1x4xf32>
    %305 = arith.subf %303, %304 : vector<1x4xf32>
    %306 = arith.mulf %299, %266 : vector<1x4xf32>
    %307 = arith.mulf %298, %305 : vector<1x4xf32>
    %308 = arith.addf %306, %307 : vector<1x4xf32>
    %309 = math.tanh %308 : vector<1x4xf32>
    %310 = arith.mulf %300, %309 : vector<1x4xf32>
    %c6_i32 = arith.constant 6 : i32
    %311 = vector.broadcast %c6_i32 : i32 to vector<8x1xi32>
    %312 = arith.cmpi eq, %22, %311 : vector<8x1xi32>
    %313 = vector.shape_cast %312 : vector<8x1xi1> to vector<8x1xi1>
    %314 = vector.broadcast %313 : vector<8x1xi1> to vector<8x4xi1>
    %315 = vector.shape_cast %310 : vector<1x4xf32> to vector<1x4xf32>
    %316 = vector.broadcast %315 : vector<1x4xf32> to vector<8x4xf32>
    %317 = arith.select %314, %316, %275 : vector<8x4xi1>, vector<8x4xf32>
    %318 = vector.extract_strided_slice %310 {offsets = [0, 0], sizes = [1, 1], strides = [1, 1]} : vector<1x4xf32> to vector<1x1xf32>
    %319 = vector.broadcast %318 : vector<1x1xf32> to vector<1x16xf32>
    %320 = arith.mulf %14, %319 : vector<1x16xf32>
    %321 = vector.extract_strided_slice %310 {offsets = [0, 1], sizes = [1, 1], strides = [1, 1]} : vector<1x4xf32> to vector<1x1xf32>
    %322 = vector.broadcast %321 : vector<1x1xf32> to vector<1x16xf32>
    %323 = arith.mulf %15, %322 : vector<1x16xf32>
    %324 = arith.addf %320, %323 : vector<1x16xf32>
    %325 = vector.extract_strided_slice %310 {offsets = [0, 2], sizes = [1, 1], strides = [1, 1]} : vector<1x4xf32> to vector<1x1xf32>
    %326 = vector.broadcast %325 : vector<1x1xf32> to vector<1x16xf32>
    %327 = arith.mulf %16, %326 : vector<1x16xf32>
    %328 = arith.addf %324, %327 : vector<1x16xf32>
    %329 = vector.extract_strided_slice %310 {offsets = [0, 3], sizes = [1, 1], strides = [1, 1]} : vector<1x4xf32> to vector<1x1xf32>
    %330 = vector.broadcast %329 : vector<1x1xf32> to vector<1x16xf32>
    %331 = arith.mulf %17, %330 : vector<1x16xf32>
    %332 = arith.addf %328, %331 : vector<1x16xf32>
    %333 = vector.extract_strided_slice %13 {offsets = [7, 0], sizes = [1, 16], strides = [1, 1]} : vector<8x16xf32> to vector<1x16xf32>
    %334 = arith.addf %333, %332 : vector<1x16xf32>
    %335 = arith.negf %334 : vector<1x16xf32>
    %336 = math.exp %335 : vector<1x16xf32>
    %cst_41 = arith.constant 1.000000e+00 : f32
    %337 = vector.broadcast %cst_41 : f32 to vector<1x16xf32>
    %338 = arith.addf %337, %336 : vector<1x16xf32>
    %339 = arith.divf %337, %338 : vector<1x16xf32>
    %340 = vector.extract_strided_slice %339 {offsets = [0, 0], sizes = [1, 4], strides = [1, 1]} : vector<1x16xf32> to vector<1x4xf32>
    %341 = vector.extract_strided_slice %339 {offsets = [0, 4], sizes = [1, 4], strides = [1, 1]} : vector<1x16xf32> to vector<1x4xf32>
    %342 = vector.extract_strided_slice %339 {offsets = [0, 12], sizes = [1, 4], strides = [1, 1]} : vector<1x16xf32> to vector<1x4xf32>
    %343 = vector.extract_strided_slice %339 {offsets = [0, 8], sizes = [1, 4], strides = [1, 1]} : vector<1x16xf32> to vector<1x4xf32>
    %cst_42 = arith.constant 2.000000e+00 : f32
    %344 = vector.broadcast %cst_42 : f32 to vector<1x4xf32>
    %345 = arith.mulf %344, %343 : vector<1x4xf32>
    %cst_43 = arith.constant 1.000000e+00 : f32
    %346 = vector.broadcast %cst_43 : f32 to vector<1x4xf32>
    %347 = arith.subf %345, %346 : vector<1x4xf32>
    %348 = arith.mulf %341, %308 : vector<1x4xf32>
    %349 = arith.mulf %340, %347 : vector<1x4xf32>
    %350 = arith.addf %348, %349 : vector<1x4xf32>
    %351 = math.tanh %350 : vector<1x4xf32>
    %352 = arith.mulf %342, %351 : vector<1x4xf32>
    %c7_i32 = arith.constant 7 : i32
    %353 = vector.broadcast %c7_i32 : i32 to vector<8x1xi32>
    %354 = arith.cmpi eq, %22, %353 : vector<8x1xi32>
    %355 = vector.shape_cast %354 : vector<8x1xi1> to vector<8x1xi1>
    %356 = vector.broadcast %355 : vector<8x1xi1> to vector<8x4xi1>
    %357 = vector.shape_cast %352 : vector<1x4xf32> to vector<1x4xf32>
    %358 = vector.broadcast %357 : vector<1x4xf32> to vector<8x4xf32>
    %359 = arith.select %356, %358, %317 : vector<8x4xi1>, vector<8x4xf32>
    %c12 = arith.constant 12 : index
    %c0_44 = arith.constant 0 : index
    %360 = vector.load %arg3[%c12, %c0_44] : memref<17x16xf32, #tpu.memory_space<vmem>>, vector<4x2xf32>
    %c16 = arith.constant 16 : index
    %c0_45 = arith.constant 0 : index
    %361 = vector.load %arg3[%c16, %c0_45] : memref<17x16xf32, #tpu.memory_space<vmem>>, vector<1x2xf32>
    %cst_46 = arith.constant dense<0.000000e+00> : vector<8x2xf32>
    %362 = tpu.matmul %359, %360, %cst_46 {dimension_numbers = #tpu.dot_dimension_numbers<[1], [0], [0], [1], [0, 0, 1, 1], [], []>} : vector<8x4xf32>, vector<4x2xf32>, vector<8x2xf32> -> vector<8x2xf32>
    %363 = vector.broadcast %361 : vector<1x2xf32> to vector<8x2xf32>
    %364 = arith.addf %362, %363 : vector<8x2xf32>
    %365 = vector.extract_strided_slice %364 {offsets = [0, 0], sizes = [8, 1], strides = [1, 1]} : vector<8x2xf32> to vector<8x1xf32>
    %366 = vector.extract_strided_slice %364 {offsets = [0, 1], sizes = [8, 1], strides = [1, 1]} : vector<8x2xf32> to vector<8x1xf32>
    %367 = arith.subf %365, %366 : vector<8x1xf32>
    %368 = arith.negf %367 : vector<8x1xf32>
    %369 = math.exp %368 : vector<8x1xf32>
    %cst_47 = arith.constant 1.000000e+00 : f32
    %370 = vector.broadcast %cst_47 : f32 to vector<8x1xf32>
    %371 = arith.addf %370, %369 : vector<8x1xf32>
    %372 = arith.divf %370, %371 : vector<8x1xf32>
    %cst_48 = arith.constant 1.000000e+00 : f32
    %373 = vector.broadcast %cst_48 : f32 to vector<8x1xf32>
    %374 = arith.subf %373, %372 : vector<8x1xf32>
    %375 = tpu.concatenate %372, %374 in 1 : vector<8x1xf32>, vector<8x1xf32> -> vector<8x2xf32>
    %cst_49 = arith.constant 0.000000e+00 : f32
    %376 = vector.broadcast %cst_49 : f32 to vector<10x4xf32>
    %c0_50 = arith.constant 0 : index
    %c0_51 = arith.constant 0 : index
    %377 = vector.load %arg4[%c0_50, %c0_51] : memref<10x4xf32, #tpu.memory_space<vmem>>, vector<10x4xf32>
    tpu.vector_store %arg4[%c0_50, %c0_51], %376 {strides = array<i32>} : memref<10x4xf32, #tpu.memory_space<vmem>>, vector<10x4xf32>,
    %c0_52 = arith.constant 0 : index
    %c0_53 = arith.constant 0 : index
    %378 = vector.load %arg4[%c0_52, %c0_53] : memref<10x4xf32, #tpu.memory_space<vmem>>, vector<8x2xf32>
    tpu.vector_store %arg4[%c0_52, %c0_53], %375 {strides = array<i32>} : memref<10x4xf32, #tpu.memory_space<vmem>>, vector<8x2xf32>,
    %c8_54 = arith.constant 8 : index
    %c0_55 = arith.constant 0 : index
    %379 = vector.load %arg4[%c8_54, %c0_55] : memref<10x4xf32, #tpu.memory_space<vmem>>, vector<1x4xf32>
    tpu.vector_store %arg4[%c8_54, %c0_55], %352 {strides = array<i32>} : memref<10x4xf32, #tpu.memory_space<vmem>>, vector<1x4xf32>,
    %c9_56 = arith.constant 9 : index
    %c0_57 = arith.constant 0 : index
    %380 = vector.load %arg4[%c9_56, %c0_57] : memref<10x4xf32, #tpu.memory_space<vmem>>, vector<1x4xf32>
    tpu.vector_store %arg4[%c9_56, %c0_57], %350 {strides = array<i32>} : memref<10x4xf32, #tpu.memory_space<vmem>>, vector<1x4xf32>,
    return
  }
}

</mosaic_0001>

<bundles_post_ra>
// kernel: policy_forward.1
= control target key start
LH: loop header
LB: loop body
LE: loop exit
PB: predicated region body
PF: predicated region fallthrough
CT: control target
= control target key end

     0   :  { %vm55_vm0 = vcmask 1041408   ;;  %v947_v2 = vmov 0   ;;  %v948_v3 = vmov 2   ;;  %v949_v12 = vmov 1   ;;  %s952_s23 = smov 120   ;;  %s953_s26 = smov 4   ;;  %s1212_s3 = inlined_call_operand.vmem [shape: f32[17,16], index: 3, kind: input, shape index: {}]   ;;  %s1213_s0 = inlined_call_operand.vmem [shape: f32[8,1,2], index: 0, kind: input, shape index: {}]   ;;  %s1214_s1 = inlined_call_operand.vmem [shape: f32[1,1,4], index: 1, kind: input, shape index: {}]   ;;  %s1215_s4 = inlined_call_operand.vmem [shape: f32[10,4], index: 4, kind: output, shape index: {}]   ;;  %s1216_s2 = inlined_call_operand.vmem [shape: f32[1,1,4], index: 2, kind: input, shape index: {}]  }
   0x1   :  { %v25_v0 = vld [vmem:[%s1212_s3] sm:$0x3]  ;;  %858 = vset.pattern.permute.xlu0 %v947_v2  ;;  %860 = vset.pattern.permute.xlu1 %v948_v3  ;;  %v19_v5 = vld [vmem:[%s1213_s0 + $0x2] sm:$0x1]  ;;  %v20_v6 = vld [vmem:[%s1213_s0 + $0x3] sm:$0x1] }
   0x2   :  { %v17_v1 = vld [vmem:[%s1213_s0] sm:$0x1]  ;;  %819 = vmatpush.msk.msra.mxu0 %vm55_vm0, %v25_v0  ;;  %v18_v4 = vld [vmem:[%s1213_s0 + $0x1] sm:$0x1]  ;;  %v21_v7 = vld [vmem:[%s1213_s0 + $0x4] sm:$0x1] }
   0x3   :  { %36 = vst [vmem:[#allocation1] ss:$9 sm:$0xff] %v17_v1  ;;  %v115_v8 = vld [vmem:[%s1214_s1] sm:$0x1]  ;;  %v22_v9 = vld [vmem:[%s1213_s0 + $0x5] sm:$0x1] }
   0x4   :  { %38 = vst [vmem:[#allocation1 + $0x1] ss:$9 sm:$0xff] %v18_v4  ;;  %121 = vperm.xlu0 %858, %v115_v8   ;;  %134 = vperm.xlu1 %860, %v115_v8   ;;  %v23_v10 = vld [vmem:[%s1213_s0 + $0x6] sm:$0x1]  ;;  %v24_v11 = vld [vmem:[%s1213_s0 + $0x7] sm:$0x1] }
   0x5   :  { %40 = vst [vmem:[#allocation1 + $0x2] ss:$9 sm:$0xff] %v19_v5  ;;  %vm52_vm1 = vcmask 15360   ;;  %v950_v14 = vmov 3   ;;  %v80_v15 = vld [vmem:[%s1212_s3 + $0x3] sm:$0xf] }
   0x6   :  { %42 = vst [vmem:[#allocation1 + $0x3] ss:$9 sm:$0xff] %v20_v6  ;;  %vm87_vm2 = vcmask 1043456   ;;  %vm83_vm3 = vcmask 31744   ;;  %v951_v16 = vmov 0.0   ;;  %s954_s27 = smov 8  }
   0x7   :  { %44 = vst [vmem:[#allocation1 + $0x4] ss:$9 sm:$0xff] %v21_v7  ;;  %821 = vmatpush.msk.msra.mxu1 %vm87_vm2, %v80_v15  ;;  %v891_v17 = vld [vmem:[%s1212_s3 + $0x2] ss:$0 sm:$0xff]  ;;  %v1035_v26 = vld [vmem:[%s1212_s3 + $0x7] sm:$0x1] }
   0x8   :  { %46 = vst [vmem:[#allocation1 + $0x5] ss:$9 sm:$0xff] %v22_v9  ;;  %v1040_v27 = vld [vmem:[%s1212_s3 + $0x8] sm:$0x1]  ;;  %v1047_v31 = vld [vmem:[%s1212_s3 + $0x9] sm:$0x1] }
   0x9   :  { %48 = vst [vmem:[#allocation1 + $0x6] ss:$9 sm:$0xff] %v23_v10  ;;  %v1053_v36 = vld [vmem:[%s1212_s3 + $0xa] sm:$0x1]  ;;  %v892_v39 = vld [vmem:[%s1212_s3 + $0xb] ss:$0 sm:$0xff] }
   0xa   :  { %50 = vst [vmem:[#allocation1 + $0x7] ss:$9 sm:$0xff] %v24_v11  ;;  %v893_v59 = vld [vmem:[%s1216_s2] ss:$0 sm:$0xff]  ;;  %v955_v3 = vmov 14   ;;  %v956_v4 = vmov 13  }
   0xb   :  { %800 = vst.msk [vmem:[%s1215_s4] sm:$0xff] %vm83_vm3, %v951_v16  ;;  %864 = vset.pattern.permute.xlu2 %v955_v3  ;;  %v957_v5 = vmov 12   ;;  %s959_s29 = smov 116   ;;  %s960_s9 = smov 127  }
   0xc   :  { %859 = vset.pattern.permute.xlu0 %v949_v12  ;;  %861 = vset.pattern.permute.xlu1 %v950_v14  ;;  %s961_s0 = smov 124  }
   0xd   :  { %127 = vperm.xlu0 %859, %v115_v8   ;;  %141 = vperm.xlu1 %861, %v115_v8   ;;  %v958_v8 = vmov 15  }
  0x11   :  { %v51_v13 = vld [vmem:[#allocation1] sm:$0xff] }
  0x12   :  { %820 = vmatmul.msk.f32.vlgmr.msra.gmra.mxu0 %vm52_vm1, %v51_v13 }
  0x15   :  { %863 = vset.pattern.permute.xlu1 %v956_v4  ;;  %862 = vset.pattern.permute.xlu0 %v957_v5 }
  0x76   :  { %v122_v21 = vpop.permute.xlu0 %121  ;;  %v135_v22 = vpop.permute.xlu1 %134 }
  0x77   :  { %v124_v24 = vperm.slane %v122_v21, 0  ;;  %v137_v29 = vperm.slane %v135_v22, 0 }
  0x79   :  { %v125_v28 = vmul.f32 %v124_v24, %v1035_v26  ;;  %v138_v33 = vmul.f32 %v137_v29, %v1047_v31 }
  0x7f   :  { %v128_v23 = vpop.permute.xlu0 %127  ;;  %v142_v32 = vpop.permute.xlu1 %141 }
  0x80   :  { %v130_v25 = vperm.slane %v128_v23, 0  ;;  %v144_v35 = vperm.slane %v142_v32, 0 }
  0x82   :  { %v131_v30 = vmul.f32 %v130_v25, %v1040_v27  ;;  %v145_v38 = vmul.f32 %v144_v35, %v1053_v36 }
  0x84   :  { %v132_v34 = vadd.f32 %v131_v30, %v125_v28 }
  0x86   :  { %v139_v37 = vadd.f32 %v138_v33, %v132_v34 }
  0x88   :  { %v146_v41 = vadd.f32 %v145_v38, %v139_v37 }
  0x8f   :  { %v76_v18 = vpop.f32.mrf.mxu0 }
  0x90   :  { %v77_v19 = vadd.f32 %v891_v17, %v76_v18 }
  0x92   :  { %v79_v20 = vmax.f32 %v77_v19, 0.0 }
  0x94   :  { %822 = vmatmul.msk.f32.vlgmr.msra.gmra.mxu1 %vm83_vm3, %v79_v20 }
 0x111   :  { %v108_v40 = vpop.f32.mrf.mxu1 }
 0x112   :  { %v1059_v42 = vadd.f32 %v892_v39, %v108_v40 }
 0x114   :  { %v147_v43 = vadd.f32 %v146_v41, %v1059_v42 }
 0x116   :  { %v823_v44 = vmul.f32 -1.442695, %v147_v43 }
 0x118   :  { %895 = vpow2.f32 %v823_v44 }
 0x11e   :  { %v896_v45 = vpop.eup %895 }
 0x11f   :  { %v151_v46 = vadd.f32 1.0, %v896_v45 }
 0x121   :  { %897 = vrcp.f32 %v151_v46  ;;  %v163_v50 = vand.u32 2147483648, %v151_v46  ;;  %v161_v52 = vand.u32 2147483647, %v151_v46  ;;  %vm157_vm5 = vweird.f32 %v151_v46 }
 0x123   :  { %v164_v54 = vor.u32 1.1754944e-38, %v163_v50  ;;  %vm162_vm7 = vcmp.eq.f32.partialorder %v161_v52, 8.507059e+37  ;;  %v117_v50 = vlaneseq }
 0x127   :  { %v898_v47 = vpop.eup %897 }
 0x128   :  { %v153_v48 = vmul.f32 %v898_v47, %v151_v46  ;;  %vm158_vm4 = vweird.f32 %v898_v47 }
 0x129   :  { %vm159_vm6 = vmor %vm157_vm5, %vm158_vm4 }
 0x12a   :  { %v154_v49 = vsub.f32 1.0, %v153_v48 }
 0x12c   :  { %v155_v51 = vmul.f32 %v898_v47, %v154_v49 }
 0x12e   :  { %v156_v53 = vadd.f32 %v898_v47, %v155_v51  ;;  %v1093_v51 = vshrl.u32 %v117_v50, 7 }
 0x130   :  { %v160_v55 = vsel %vm159_vm6, %v898_v47, %v156_v53  ;;  %vm191_vm12 = vcmp.eq.s32.totalorder %v1093_v51, 0  ;;  %vm265_vm13 = vcmp.eq.s32.totalorder %v1093_v51, 1  ;;  %vm343_vm5 = vcmp.eq.s32.totalorder %v1093_v51, 2 }
 0x131   :  { %v165_v56 = vsel %vm162_vm7, %v164_v54, %v160_v55 }
 0x132   :  { %v167_v57 = vmul.f32 2.0, %v165_v56 }
 0x134   :  { %v824_v58 = vadd.f32 -1.0, %v167_v57 }
 0x136   :  { %176 = vrot.lane.b32.xlu2 %v824_v58, %s952_s23 }
 0x13e   :  { %171 = vrot.lane.b32.xlu2 %v893_v59, %s953_s26 }
 0x190   :  { %v177_v60 = vpop.permute.xlu2 %176 }
 0x191   :  { %v179_v61 = vmul.f32 %v177_v60, %v165_v56 }
 0x193   :  { %181 = vrot.lane.b32.xlu1 %v179_v61, %s953_s26 }
 0x198   :  { %v172_v62 = vpop.permute.xlu2 %171 }
 0x199   :  { %v174_v63 = vmul.f32 %v172_v62, %v165_v56 }
 0x205   :  { %v182_v0 = vpop.permute.xlu1 %181 }
 0x206   :  { %v184_v1 = vadd.f32 %v182_v0, %v174_v63 }
 0x208   :  { %899 = vtanh.f32 %v184_v1  ;;  %v246_v45 = vrot.slane %v184_v1, 7 }
 0x20e   :  { %v900_v2 = vpop.eup %899 }
 0x20f   :  { %187 = vrot.lane.b32.xlu2 %v900_v2, %s954_s27 }
 0x269   :  { %v188_v6 = vpop.permute.xlu2 %187 }
 0x26a   :  { %v1072_v7 = vmul.f32 %v188_v6, %v165_v56 }
 0x26c   :  { %209 = vperm.xlu2 %864, %v1072_v7   ;;  %203 = vperm.xlu1 %863, %v1072_v7   ;;  %v194_v52 = vperm.slane %v1072_v7, 0 }
 0x26d   :  { %198 = vperm.xlu0 %862, %v1072_v7  }
 0x26e   :  { %v195_v56 = vsel %vm191_vm12, %v194_v52, 0.0 }
 0x274   :  { %865 = vset.pattern.permute.xlu1 %v958_v8  ;;  %866 = vset.pattern.permute.xlu2 %v957_v5 }
 0x275   :  { %215 = vperm.xlu1 %865, %v1072_v7   ;;  %867 = vset.pattern.permute.xlu0 %v956_v4 }
 0x27d   :  { %868 = vset.pattern.permute.xlu1 %v955_v3 }
 0x2c6   :  { %v210_v13 = vpop.permute.xlu2 %209 }
 0x2c7   :  { %v212_v15 = vmul.f32 %v210_v13, %v1047_v31 }
 0x2de   :  { %v204_v9 = vpop.permute.xlu1 %203 }
 0x2df   :  { %v199_v10 = vpop.permute.xlu0 %198  ;;  %v206_v11 = vmul.f32 %v204_v9, %v1040_v27 }
 0x2e0   :  { %v201_v12 = vmul.f32 %v199_v10, %v1035_v26 }
 0x2e2   :  { %v207_v14 = vadd.f32 %v206_v11, %v201_v12 }
 0x2e4   :  { %v213_v18 = vadd.f32 %v212_v15, %v207_v14 }
 0x2e7   :  { %v216_v17 = vpop.permute.xlu1 %215 }
 0x2e8   :  { %v218_v19 = vmul.f32 %v216_v17, %v1053_v36 }
 0x2ea   :  { %v219_v20 = vadd.f32 %v218_v19, %v213_v18 }
 0x2ec   :  { %v221_v21 = vrot.slane %v219_v20, 7 }
 0x2ee   :  { %v223_v22 = vadd.f32 %v221_v21, %v1059_v42 }
 0x2f0   :  { %v825_v23 = vmul.f32 -1.442695, %v223_v22 }
 0x2f2   :  { %901 = vpow2.f32 %v825_v23 }
 0x2f8   :  { %v902_v24 = vpop.eup %901 }
 0x2f9   :  { %v227_v25 = vadd.f32 1.0, %v902_v24 }
 0x2fb   :  { %903 = vrcp.f32 %v227_v25  ;;  %v239_v32 = vand.u32 2147483648, %v227_v25  ;;  %v237_v34 = vand.u32 2147483647, %v227_v25  ;;  %vm233_vm9 = vweird.f32 %v227_v25 }
 0x2fd   :  { %v240_v37 = vor.u32 1.1754944e-38, %v239_v32  ;;  %vm238_vm11 = vcmp.eq.f32.partialorder %v237_v34, 8.507059e+37 }
 0x301   :  { %v904_v28 = vpop.eup %903 }
 0x302   :  { %v229_v29 = vmul.f32 %v904_v28, %v227_v25  ;;  %vm234_vm8 = vweird.f32 %v904_v28 }
 0x303   :  { %vm235_vm10 = vmor %vm233_vm9, %vm234_vm8 }
 0x304   :  { %v230_v30 = vsub.f32 1.0, %v229_v29 }
 0x306   :  { %v231_v33 = vmul.f32 %v904_v28, %v230_v30 }
 0x308   :  { %v232_v35 = vadd.f32 %v904_v28, %v231_v33 }
 0x30a   :  { %v236_v38 = vsel %vm235_vm10, %v904_v28, %v232_v35  ;;  %vm421_vm10 = vcmp.eq.s32.totalorder %v1093_v51, 3 }
 0x30b   :  { %v241_v39 = vsel %vm238_vm11, %v240_v37, %v236_v38 }
 0x30c   :  { %v243_v40 = vmul.f32 2.0, %v241_v39  ;;  %v248_v46 = vmul.f32 %v246_v45, %v241_v39 }
 0x30e   :  { %v826_v41 = vadd.f32 -1.0, %v243_v40 }
 0x310   :  { %250 = vrot.lane.b32.xlu2 %v826_v41, %s952_s23 }
 0x36a   :  { %v251_v43 = vpop.permute.xlu2 %250 }
 0x36b   :  { %v253_v44 = vmul.f32 %v251_v43, %v241_v39 }
 0x36d   :  { %255 = vrot.lane.b32.xlu0 %v253_v44, %s953_s26 }
 0x3df   :  { %v256_v47 = vpop.permute.xlu0 %255 }
 0x3e0   :  { %v1089_v48 = vadd.f32 %v256_v47, %v248_v46 }
 0x3e2   :  { %905 = vtanh.f32 %v1089_v48  ;;  %v324_v37 = vrot.slane %v1089_v48, 7 }
 0x3e8   :  { %v906_v49 = vpop.eup %905 }
 0x3e9   :  { %261 = vrot.lane.b32.xlu1 %v906_v49, %s954_s27 }
 0x45b   :  { %v262_v53 = vpop.permute.xlu1 %261 }
 0x45c   :  { %v264_v54 = vmul.f32 %v262_v53, %v241_v39 }
 0x45e   :  { %v268_v55 = vperm.slane %v264_v54, 1  ;;  %285 = vperm.xlu1 %868, %v264_v54   ;;  %278 = vperm.xlu0 %867, %v264_v54  }
 0x45f   :  { %272 = vperm.xlu2 %866, %v264_v54  }
 0x460   :  { %v1098_v57 = vsel %vm265_vm13, %v268_v55, %v195_v56 }
 0x466   :  { %870 = vset.pattern.permute.xlu1 %v957_v5  ;;  %872 = vset.pattern.permute.xlu0 %v955_v3 }
 0x467   :  { %869 = vset.pattern.permute.xlu2 %v958_v8 }
 0x468   :  { %292 = vperm.xlu2 %869, %v264_v54  }
 0x470   :  { %871 = vset.pattern.permute.xlu2 %v956_v4 }
 0x4b9   :  { %v273_v58 = vpop.permute.xlu2 %272 }
 0x4ba   :  { %v274_v59 = vrot.slane %v273_v58, 1 }
 0x4bc   :  { %v276_v1 = vmul.f32 %v274_v59, %v1035_v26 }
 0x4c2   :  { %v293_v60 = vpop.permute.xlu2 %292 }
 0x4c3   :  { %v294_v2 = vrot.slane %v293_v60, 1 }
 0x4c5   :  { %v296_v10 = vmul.f32 %v294_v2, %v1053_v36 }
 0x4d0   :  { %v286_v61 = vpop.permute.xlu1 %285  ;;  %v279_v62 = vpop.permute.xlu0 %278 }
 0x4d1   :  { %v287_v63 = vrot.slane %v286_v61, 1  ;;  %v280_v0 = vrot.slane %v279_v62, 1 }
 0x4d3   :  { %v282_v6 = vmul.f32 %v280_v0, %v1040_v27  ;;  %v289_v7 = vmul.f32 %v287_v63, %v1047_v31 }
 0x4d5   :  { %v283_v9 = vadd.f32 %v282_v6, %v276_v1 }
 0x4d7   :  { %v290_v11 = vadd.f32 %v289_v7, %v283_v9 }
 0x4d9   :  { %v297_v12 = vadd.f32 %v296_v10, %v290_v11 }
 0x4db   :  { %v299_v13 = vrot.slane %v297_v12, 6 }
 0x4dd   :  { %v301_v14 = vadd.f32 %v299_v13, %v1059_v42 }
 0x4df   :  { %v827_v15 = vmul.f32 -1.442695, %v301_v14 }
 0x4e1   :  { %907 = vpow2.f32 %v827_v15 }
 0x4e7   :  { %v908_v17 = vpop.eup %907 }
 0x4e8   :  { %v305_v18 = vadd.f32 1.0, %v908_v17 }
 0x4ea   :  { %909 = vrcp.f32 %v305_v18  ;;  %v317_v22 = vand.u32 2147483648, %v305_v18  ;;  %v315_v24 = vand.u32 2147483647, %v305_v18  ;;  %vm311_vm15 = vweird.f32 %v305_v18 }
 0x4ec   :  { %v318_v28 = vor.u32 1.1754944e-38, %v317_v22  ;;  %vm316_vm4 = vcmp.eq.f32.partialorder %v315_v24, 8.507059e+37 }
 0x4f0   :  { %v910_v19 = vpop.eup %909 }
 0x4f1   :  { %v307_v20 = vmul.f32 %v910_v19, %v305_v18  ;;  %vm312_vm14 = vweird.f32 %v910_v19 }
 0x4f2   :  { %vm313_vm0 = vmor %vm311_vm15, %vm312_vm14  ;;  %vm499_vm15 = vcmp.eq.s32.totalorder %v1093_v51, 4 }
 0x4f3   :  { %v308_v21 = vsub.f32 1.0, %v307_v20 }
 0x4f5   :  { %v309_v23 = vmul.f32 %v910_v19, %v308_v21 }
 0x4f7   :  { %v310_v25 = vadd.f32 %v910_v19, %v309_v23 }
 0x4f9   :  { %v314_v29 = vsel %vm313_vm0, %v910_v19, %v310_v25 }
 0x4fa   :  { %v319_v30 = vsel %vm316_vm4, %v318_v28, %v314_v29 }
 0x4fb   :  { %v321_v32 = vmul.f32 2.0, %v319_v30  ;;  %v326_v38 = vmul.f32 %v324_v37, %v319_v30 }
 0x4fd   :  { %v828_v33 = vadd.f32 -1.0, %v321_v32 }
 0x4ff   :  { %328 = vrot.lane.b32.xlu1 %v828_v33, %s952_s23 }
 0x571   :  { %v329_v34 = vpop.permute.xlu1 %328 }
 0x572   :  { %v331_v35 = vmul.f32 %v329_v34, %v319_v30 }
 0x574   :  { %333 = vrot.lane.b32.xlu2 %v331_v35, %s953_s26 }
 0x5ce   :  { %v334_v39 = vpop.permute.xlu2 %333 }
 0x5cf   :  { %v336_v40 = vadd.f32 %v334_v39, %v326_v38 }
 0x5d1   :  { %911 = vtanh.f32 %v336_v40  ;;  %v402_v23 = vrot.slane %v336_v40, 7 }
 0x5d7   :  { %v912_v41 = vpop.eup %911 }
 0x5d8   :  { %339 = vrot.lane.b32.xlu0 %v912_v41, %s954_s27 }
 0x64a   :  { %v340_v43 = vpop.permute.xlu0 %339 }
 0x64b   :  { %v342_v44 = vmul.f32 %v340_v43, %v319_v30 }
 0x64d   :  { %v346_v45 = vperm.slane %v342_v44, 2  ;;  %363 = vperm.xlu0 %872, %v342_v44   ;;  %356 = vperm.xlu2 %871, %v342_v44  }
 0x64e   :  { %350 = vperm.xlu1 %870, %v342_v44  }
 0x64f   :  { %v1115_v46 = vsel %vm343_vm5, %v346_v45, %v1098_v57 }
 0x655   :  { %874 = vset.pattern.permute.xlu0 %v957_v5  ;;  %876 = vset.pattern.permute.xlu2 %v955_v3 }
 0x656   :  { %873 = vset.pattern.permute.xlu1 %v958_v8 }
 0x657   :  { %370 = vperm.xlu1 %873, %v342_v44  }
 0x65f   :  { %875 = vset.pattern.permute.xlu1 %v956_v4 }
 0x6a7   :  { %v357_v47 = vpop.permute.xlu2 %356 }
 0x6a8   :  { %v358_v50 = vrot.slane %v357_v47, 2 }
 0x6aa   :  { %v360_v54 = vmul.f32 %v358_v50, %v1040_v27 }
 0x6bf   :  { %v364_v52 = vpop.permute.xlu0 %363 }
 0x6c0   :  { %v351_v48 = vpop.permute.xlu1 %350  ;;  %v365_v55 = vrot.slane %v364_v52, 2 }
 0x6c1   :  { %v352_v49 = vrot.slane %v351_v48, 2 }
 0x6c2   :  { %v367_v58 = vmul.f32 %v365_v55, %v1047_v31 }
 0x6c3   :  { %v354_v53 = vmul.f32 %v352_v49, %v1035_v26 }
 0x6c5   :  { %v361_v56 = vadd.f32 %v360_v54, %v354_v53 }
 0x6c7   :  { %v368_v60 = vadd.f32 %v367_v58, %v361_v56 }
 0x6c9   :  { %v371_v57 = vpop.permute.xlu1 %370 }
 0x6ca   :  { %v372_v59 = vrot.slane %v371_v57, 2 }
 0x6cc   :  { %v374_v61 = vmul.f32 %v372_v59, %v1053_v36 }
 0x6ce   :  { %v375_v62 = vadd.f32 %v374_v61, %v368_v60 }
 0x6d0   :  { %v377_v63 = vrot.slane %v375_v62, 5 }
 0x6d2   :  { %v379_v0 = vadd.f32 %v377_v63, %v1059_v42 }
 0x6d4   :  { %v829_v1 = vmul.f32 -1.442695, %v379_v0 }
 0x6d6   :  { %913 = vpow2.f32 %v829_v1 }
 0x6dc   :  { %v914_v2 = vpop.eup %913 }
 0x6dd   :  { %v383_v6 = vadd.f32 1.0, %v914_v2 }
 0x6df   :  { %915 = vrcp.f32 %v383_v6  ;;  %v395_v11 = vand.u32 2147483648, %v383_v6  ;;  %v393_v13 = vand.u32 2147483647, %v383_v6  ;;  %vm389_vm7 = vweird.f32 %v383_v6 }
 0x6e1   :  { %v396_v15 = vor.u32 1.1754944e-38, %v395_v11  ;;  %vm394_vm9 = vcmp.eq.f32.partialorder %v393_v13, 8.507059e+37 }
 0x6e5   :  { %v916_v7 = vpop.eup %915 }
 0x6e6   :  { %v385_v9 = vmul.f32 %v916_v7, %v383_v6  ;;  %vm390_vm6 = vweird.f32 %v916_v7 }
 0x6e7   :  { %vm391_vm8 = vmor %vm389_vm7, %vm390_vm6  ;;  %vm577_vm7 = vcmp.eq.s32.totalorder %v1093_v51, 5 }
 0x6e8   :  { %v386_v10 = vsub.f32 1.0, %v385_v9 }
 0x6ea   :  { %v387_v12 = vmul.f32 %v916_v7, %v386_v10 }
 0x6ec   :  { %v388_v14 = vadd.f32 %v916_v7, %v387_v12 }
 0x6ee   :  { %v392_v17 = vsel %vm391_vm8, %v916_v7, %v388_v14 }
 0x6ef   :  { %v397_v18 = vsel %vm394_vm9, %v396_v15, %v392_v17 }
 0x6f0   :  { %v399_v19 = vmul.f32 2.0, %v397_v18  ;;  %v404_v24 = vmul.f32 %v402_v23, %v397_v18 }
 0x6f2   :  { %v830_v20 = vadd.f32 -1.0, %v399_v19 }
 0x6f4   :  { %406 = vrot.lane.b32.xlu2 %v830_v20, %s952_s23 }
 0x74e   :  { %v407_v21 = vpop.permute.xlu2 %406 }
 0x74f   :  { %v409_v22 = vmul.f32 %v407_v21, %v397_v18 }
 0x751   :  { %411 = vrot.lane.b32.xlu1 %v409_v22, %s953_s26 }
 0x7c3   :  { %v412_v25 = vpop.permute.xlu1 %411 }
 0x7c4   :  { %v414_v28 = vadd.f32 %v412_v25, %v404_v24 }
 0x7c6   :  { %917 = vtanh.f32 %v414_v28  ;;  %v480_v12 = vrot.slane %v414_v28, 7 }
 0x7cc   :  { %v918_v29 = vpop.eup %917 }
 0x7cd   :  { %417 = vrot.lane.b32.xlu2 %v918_v29, %s954_s27 }
 0x827   :  { %v418_v30 = vpop.permute.xlu2 %417 }
 0x828   :  { %v420_v32 = vmul.f32 %v418_v30, %v397_v18 }
 0x82a   :  { %v424_v33 = vperm.slane %v420_v32, 3  ;;  %441 = vperm.xlu2 %876, %v420_v32   ;;  %434 = vperm.xlu1 %875, %v420_v32  }
 0x82b   :  { %428 = vperm.xlu0 %874, %v420_v32  }
 0x82c   :  { %v1131_v34 = vsel %vm421_vm10, %v424_v33, %v1115_v46 }
 0x832   :  { %877 = vset.pattern.permute.xlu1 %v958_v8  ;;  %878 = vset.pattern.permute.xlu2 %v957_v5 }
 0x833   :  { %448 = vperm.xlu1 %877, %v420_v32   ;;  %879 = vset.pattern.permute.xlu0 %v956_v4 }
 0x83b   :  { %880 = vset.pattern.permute.xlu1 %v955_v3 }
 0x884   :  { %v442_v40 = vpop.permute.xlu2 %441 }
 0x885   :  { %v443_v44 = vrot.slane %v442_v40, 3 }
 0x887   :  { %v445_v47 = vmul.f32 %v443_v44, %v1047_v31 }
 0x89c   :  { %v435_v35 = vpop.permute.xlu1 %434 }
 0x89d   :  { %v436_v37 = vrot.slane %v435_v35, 3  ;;  %v429_v38 = vpop.permute.xlu0 %428 }
 0x89e   :  { %v430_v39 = vrot.slane %v429_v38, 3 }
 0x89f   :  { %v438_v41 = vmul.f32 %v436_v37, %v1040_v27 }
 0x8a0   :  { %v432_v43 = vmul.f32 %v430_v39, %v1035_v26 }
 0x8a2   :  { %v439_v45 = vadd.f32 %v438_v41, %v432_v43 }
 0x8a4   :  { %v446_v49 = vadd.f32 %v445_v47, %v439_v45 }
 0x8a5   :  { %v449_v46 = vpop.permute.xlu1 %448 }
 0x8a6   :  { %v450_v48 = vrot.slane %v449_v46, 3 }
 0x8a8   :  { %v452_v50 = vmul.f32 %v450_v48, %v1053_v36 }
 0x8aa   :  { %v453_v52 = vadd.f32 %v452_v50, %v446_v49 }
 0x8ac   :  { %v455_v53 = vrot.slane %v453_v52, 4 }
 0x8ae   :  { %v457_v54 = vadd.f32 %v455_v53, %v1059_v42 }
 0x8b0   :  { %v831_v55 = vmul.f32 -1.442695, %v457_v54 }
 0x8b2   :  { %919 = vpow2.f32 %v831_v55 }
 0x8b8   :  { %v920_v56 = vpop.eup %919 }
 0x8b9   :  { %v461_v57 = vadd.f32 1.0, %v920_v56 }
 0x8bb   :  { %921 = vrcp.f32 %v461_v57  ;;  %v473_v61 = vand.u32 2147483648, %v461_v57  ;;  %v471_v63 = vand.u32 2147483647, %v461_v57  ;;  %vm467_vm12 = vweird.f32 %v461_v57 }
 0x8bd   :  { %v474_v1 = vor.u32 1.1754944e-38, %v473_v61  ;;  %vm472_vm14 = vcmp.eq.f32.partialorder %v471_v63, 8.507059e+37 }
 0x8c1   :  { %v922_v58 = vpop.eup %921 }
 0x8c2   :  { %v463_v59 = vmul.f32 %v922_v58, %v461_v57  ;;  %vm468_vm11 = vweird.f32 %v922_v58 }
 0x8c3   :  { %vm469_vm13 = vmor %vm467_vm12, %vm468_vm11  ;;  %vm655_vm12 = vcmp.eq.s32.totalorder %v1093_v51, 6 }
 0x8c4   :  { %v464_v60 = vsub.f32 1.0, %v463_v59 }
 0x8c6   :  { %v465_v62 = vmul.f32 %v922_v58, %v464_v60 }
 0x8c8   :  { %v466_v0 = vadd.f32 %v922_v58, %v465_v62 }
 0x8ca   :  { %v470_v2 = vsel %vm469_vm13, %v922_v58, %v466_v0 }
 0x8cb   :  { %v475_v6 = vsel %vm472_vm14, %v474_v1, %v470_v2 }
 0x8cc   :  { %v477_v7 = vmul.f32 2.0, %v475_v6  ;;  %v482_v13 = vmul.f32 %v480_v12, %v475_v6 }
 0x8ce   :  { %v832_v9 = vadd.f32 -1.0, %v477_v7 }
 0x8d0   :  { %484 = vrot.lane.b32.xlu2 %v832_v9, %s952_s23 }
 0x92a   :  { %v485_v10 = vpop.permute.xlu2 %484 }
 0x92b   :  { %v487_v11 = vmul.f32 %v485_v10, %v475_v6 }
 0x92d   :  { %489 = vrot.lane.b32.xlu0 %v487_v11, %s953_s26 }
 0x99f   :  { %v490_v14 = vpop.permute.xlu0 %489 }
 0x9a0   :  { %v492_v15 = vadd.f32 %v490_v14, %v482_v13 }
 0x9a2   :  { %923 = vtanh.f32 %v492_v15  ;;  %v558_v62 = vrot.slane %v492_v15, 7 }
 0x9a8   :  { %v924_v17 = vpop.eup %923 }
 0x9a9   :  { %495 = vrot.lane.b32.xlu1 %v924_v17, %s954_s27 }
 0xa1b   :  { %v496_v18 = vpop.permute.xlu1 %495 }
 0xa1c   :  { %v498_v19 = vmul.f32 %v496_v18, %v475_v6 }
 0xa1e   :  { %519 = vperm.xlu1 %880, %v498_v19   ;;  %512 = vperm.xlu0 %879, %v498_v19   ;;  %v502_v20 = vperm.slane %v498_v19, 4 }
 0xa1f   :  { %506 = vperm.xlu2 %878, %v498_v19  }
 0xa20   :  { %v1147_v21 = vsel %vm499_vm15, %v502_v20, %v1131_v34 }
 0xa26   :  { %882 = vset.pattern.permute.xlu1 %v957_v5  ;;  %884 = vset.pattern.permute.xlu0 %v955_v3 }
 0xa27   :  { %881 = vset.pattern.permute.xlu2 %v958_v8 }
 0xa28   :  { %526 = vperm.xlu2 %881, %v498_v19  }
 0xa30   :  { %883 = vset.pattern.permute.xlu2 %v956_v4 }
 0xa79   :  { %v507_v22 = vpop.permute.xlu2 %506 }
 0xa7a   :  { %v508_v23 = vrot.slane %v507_v22, 4 }
 0xa7c   :  { %v510_v32 = vmul.f32 %v508_v23, %v1035_v26 }
 0xa82   :  { %v527_v24 = vpop.permute.xlu2 %526 }
 0xa83   :  { %v528_v33 = vrot.slane %v527_v24, 4 }
 0xa85   :  { %v530_v38 = vmul.f32 %v528_v33, %v1053_v36 }
 0xa90   :  { %v520_v25 = vpop.permute.xlu1 %519  ;;  %v513_v28 = vpop.permute.xlu0 %512 }
 0xa91   :  { %v521_v29 = vrot.slane %v520_v25, 4  ;;  %v514_v30 = vrot.slane %v513_v28, 4 }
 0xa93   :  { %v516_v34 = vmul.f32 %v514_v30, %v1040_v27  ;;  %v523_v35 = vmul.f32 %v521_v29, %v1047_v31 }
 0xa95   :  { %v517_v37 = vadd.f32 %v516_v34, %v510_v32 }
 0xa97   :  { %v524_v39 = vadd.f32 %v523_v35, %v517_v37 }
 0xa99   :  { %v531_v40 = vadd.f32 %v530_v38, %v524_v39 }
 0xa9b   :  { %v533_v41 = vrot.slane %v531_v40, 3 }
 0xa9d   :  { %v535_v43 = vadd.f32 %v533_v41, %v1059_v42 }
 0xa9f   :  { %v833_v44 = vmul.f32 -1.442695, %v535_v43 }
 0xaa1   :  { %925 = vpow2.f32 %v833_v44 }
 0xaa7   :  { %v926_v45 = vpop.eup %925 }
 0xaa8   :  { %v539_v46 = vadd.f32 1.0, %v926_v45 }
 0xaaa   :  { %927 = vrcp.f32 %v539_v46  ;;  %v551_v50 = vand.u32 2147483648, %v539_v46  ;;  %v549_v53 = vand.u32 2147483647, %v539_v46  ;;  %vm545_vm4 = vweird.f32 %v539_v46 }
 0xaac   :  { %v552_v55 = vor.u32 1.1754944e-38, %v551_v50  ;;  %vm550_vm6 = vcmp.eq.f32.partialorder %v549_v53, 8.507059e+37 }
 0xab0   :  { %v928_v47 = vpop.eup %927 }
 0xab1   :  { %v541_v48 = vmul.f32 %v928_v47, %v539_v46  ;;  %vm546_vm0 = vweird.f32 %v928_v47 }
 0xab2   :  { %vm547_vm5 = vmor %vm545_vm4, %vm546_vm0  ;;  %vm733_vm4 = vcmp.eq.s32.totalorder %v1093_v51, 7  ;;  %v894_v51 = vld [vmem:[%s1212_s3 + $0x10] ss:$0 sm:$0xff] }
 0xab3   :  { %v542_v49 = vsub.f32 1.0, %v541_v48 }
 0xab5   :  { %v543_v52 = vmul.f32 %v928_v47, %v542_v49 }
 0xab7   :  { %v544_v54 = vadd.f32 %v928_v47, %v543_v52 }
 0xab9   :  { %v548_v56 = vsel %vm547_vm5, %v928_v47, %v544_v54  ;;  %vm801_vm5 = vcmask 25600  }
 0xaba   :  { %v553_v57 = vsel %vm550_vm6, %v552_v55, %v548_v56  ;;  %802 = vst.msk [vmem:[%s1215_s4 + $0x8] sm:$0x3] %vm801_vm5, %v951_v16  ;;  %vm808_vm6 = vcmask 31751  }
 0xabb   :  { %v555_v58 = vmul.f32 2.0, %v553_v57  ;;  %v560_v63 = vmul.f32 %v558_v62, %v553_v57 }
 0xabd   :  { %v834_v59 = vadd.f32 -1.0, %v555_v58 }
 0xabf   :  { %562 = vrot.lane.b32.xlu1 %v834_v59, %s952_s23 }
 0xb31   :  { %v563_v60 = vpop.permute.xlu1 %562 }
 0xb32   :  { %v565_v61 = vmul.f32 %v563_v60, %v553_v57 }
 0xb34   :  { %567 = vrot.lane.b32.xlu2 %v565_v61, %s953_s26 }
 0xb8e   :  { %v568_v0 = vpop.permute.xlu2 %567 }
 0xb8f   :  { %v570_v1 = vadd.f32 %v568_v0, %v560_v63 }
 0xb91   :  { %929 = vtanh.f32 %v570_v1  ;;  %v636_v48 = vrot.slane %v570_v1, 7 }
 0xb97   :  { %v930_v2 = vpop.eup %929 }
 0xb98   :  { %573 = vrot.lane.b32.xlu0 %v930_v2, %s954_s27 }
 0xc0a   :  { %v574_v6 = vpop.permute.xlu0 %573 }
 0xc0b   :  { %v576_v7 = vmul.f32 %v574_v6, %v553_v57 }
 0xc0d   :  { %597 = vperm.xlu0 %884, %v576_v7   ;;  %590 = vperm.xlu2 %883, %v576_v7   ;;  %v580_v9 = vperm.slane %v576_v7, 5 }
 0xc0e   :  { %584 = vperm.xlu1 %882, %v576_v7  }
 0xc0f   :  { %v1163_v10 = vsel %vm577_vm7, %v580_v9, %v1147_v21 }
 0xc15   :  { %886 = vset.pattern.permute.xlu0 %v957_v5  ;;  %888 = vset.pattern.permute.xlu2 %v955_v3 }
 0xc16   :  { %885 = vset.pattern.permute.xlu1 %v958_v8 }
 0xc17   :  { %604 = vperm.xlu1 %885, %v576_v7  }
 0xc1f   :  { %887 = vset.pattern.permute.xlu1 %v956_v4 }
 0xc67   :  { %v591_v11 = vpop.permute.xlu2 %590 }
 0xc68   :  { %v592_v14 = vrot.slane %v591_v11, 5 }
 0xc6a   :  { %v594_v18 = vmul.f32 %v592_v14, %v1040_v27 }
 0xc7f   :  { %v598_v15 = vpop.permute.xlu0 %597 }
 0xc80   :  { %v585_v12 = vpop.permute.xlu1 %584  ;;  %v599_v19 = vrot.slane %v598_v15, 5 }
 0xc81   :  { %v586_v13 = vrot.slane %v585_v12, 5 }
 0xc82   :  { %v601_v5 = vmul.f32 %v599_v19, %v1047_v31 }
 0xc83   :  { %v588_v17 = vmul.f32 %v586_v13, %v1035_v26 }
 0xc85   :  { %v595_v20 = vadd.f32 %v594_v18, %v588_v17 }
 0xc87   :  { %v602_v22 = vadd.f32 %v601_v5, %v595_v20 }
 0xc89   :  { %v605_v21 = vpop.permute.xlu1 %604 }
 0xc8a   :  { %v606_v3 = vrot.slane %v605_v21, 5 }
 0xc8c   :  { %v608_v23 = vmul.f32 %v606_v3, %v1053_v36 }
 0xc8e   :  { %v609_v24 = vadd.f32 %v608_v23, %v602_v22 }
 0xc90   :  { %v611_v4 = vrot.slane %v609_v24, 2 }
 0xc92   :  { %v613_v25 = vadd.f32 %v611_v4, %v1059_v42 }
 0xc94   :  { %v835_v28 = vmul.f32 -1.442695, %v613_v25 }
 0xc96   :  { %931 = vpow2.f32 %v835_v28 }
 0xc9c   :  { %v932_v29 = vpop.eup %931 }
 0xc9d   :  { %v617_v30 = vadd.f32 1.0, %v932_v29 }
 0xc9f   :  { %933 = vrcp.f32 %v617_v30  ;;  %v629_v35 = vand.u32 2147483648, %v617_v30  ;;  %v627_v38 = vand.u32 2147483647, %v617_v30  ;;  %vm623_vm9 = vweird.f32 %v617_v30 }
 0xca1   :  { %v630_v40 = vor.u32 1.1754944e-38, %v629_v35  ;;  %vm628_vm11 = vcmp.eq.f32.partialorder %v627_v38, 8.507059e+37 }
 0xca5   :  { %v934_v32 = vpop.eup %933 }
 0xca6   :  { %v619_v33 = vmul.f32 %v934_v32, %v617_v30  ;;  %vm624_vm8 = vweird.f32 %v934_v32 }
 0xca7   :  { %vm625_vm10 = vmor %vm623_vm9, %vm624_vm8  ;;  %vm798_vm9 = vcmask 7168  }
 0xca8   :  { %v620_v34 = vsub.f32 1.0, %v619_v33 }
 0xcaa   :  { %v621_v37 = vmul.f32 %v934_v32, %v620_v34 }
 0xcac   :  { %v622_v39 = vadd.f32 %v934_v32, %v621_v37 }
 0xcae   :  { %v626_v41 = vsel %vm625_vm10, %v934_v32, %v622_v39  ;;  %v738_v32 = vld [vmem:[%s1212_s3 + $0xc] sm:$0xf]  ;;  %s962_s3 = smov 1  }
 0xcaf   :  { %v631_v43 = vsel %vm628_vm11, %v630_v40, %v626_v41  ;;  %839 = vmatpush.msk.msra.mxu2 %vm87_vm2, %v738_v32 }
 0xcb0   :  { %v633_v44 = vmul.f32 2.0, %v631_v43  ;;  %v638_v49 = vmul.f32 %v636_v48, %v631_v43 }
 0xcb2   :  { %v836_v45 = vadd.f32 -1.0, %v633_v44 }
 0xcb4   :  { %640 = vrot.lane.b32.xlu2 %v836_v45, %s952_s23 }
 0xd0e   :  { %v641_v46 = vpop.permute.xlu2 %640 }
 0xd0f   :  { %v643_v47 = vmul.f32 %v641_v46, %v631_v43 }
 0xd11   :  { %645 = vrot.lane.b32.xlu1 %v643_v47, %s953_s26 }
 0xd83   :  { %v646_v50 = vpop.permute.xlu1 %645 }
 0xd84   :  { %v648_v52 = vadd.f32 %v646_v50, %v638_v49 }
 0xd86   :  { %935 = vtanh.f32 %v648_v52  ;;  %v714_v4 = vrot.slane %v648_v52, 7 }
 0xd8c   :  { %v936_v53 = vpop.eup %935 }
 0xd8d   :  { %651 = vrot.lane.b32.xlu2 %v936_v53, %s954_s27 }
 0xde7   :  { %v652_v54 = vpop.permute.xlu2 %651 }
 0xde8   :  { %v654_v55 = vmul.f32 %v652_v54, %v631_v43 }
 0xdea   :  { %675 = vperm.xlu2 %888, %v654_v55   ;;  %668 = vperm.xlu1 %887, %v654_v55   ;;  %v658_v56 = vperm.slane %v654_v55, 6 }
 0xdeb   :  { %662 = vperm.xlu0 %886, %v654_v55  }
 0xdec   :  { %v659_v57 = vsel %vm655_vm12, %v658_v56, %v1163_v10 }
 0xdf2   :  { %889 = vset.pattern.permute.xlu1 %v958_v8 }
 0xdf3   :  { %682 = vperm.xlu1 %889, %v654_v55   ;;  %890 = vset.pattern.permute.xlu0 %v958_v8 }
 0xe44   :  { %v676_v62 = vpop.permute.xlu2 %675 }
 0xe45   :  { %v677_v1 = vrot.slane %v676_v62, 6 }
 0xe47   :  { %v679_v7 = vmul.f32 %v677_v1, %v1047_v31 }
 0xe5c   :  { %v669_v58 = vpop.permute.xlu1 %668 }
 0xe5d   :  { %v670_v59 = vrot.slane %v669_v58, 6  ;;  %v663_v60 = vpop.permute.xlu0 %662 }
 0xe5e   :  { %v664_v61 = vrot.slane %v663_v60, 6 }
 0xe5f   :  { %v672_v63 = vmul.f32 %v670_v59, %v1040_v27 }
 0xe60   :  { %v666_v0 = vmul.f32 %v664_v61, %v1035_v26 }
 0xe62   :  { %v673_v2 = vadd.f32 %v672_v63, %v666_v0 }
 0xe64   :  { %v680_v10 = vadd.f32 %v679_v7, %v673_v2 }
 0xe65   :  { %v683_v6 = vpop.permute.xlu1 %682 }
 0xe66   :  { %v684_v9 = vrot.slane %v683_v6, 6 }
 0xe68   :  { %v686_v11 = vmul.f32 %v684_v9, %v1053_v36 }
 0xe6a   :  { %v687_v12 = vadd.f32 %v686_v11, %v680_v10 }
 0xe6c   :  { %v689_v8 = vrot.slane %v687_v12, 1 }
 0xe6e   :  { %v691_v13 = vadd.f32 %v689_v8, %v1059_v42 }
 0xe70   :  { %v837_v14 = vmul.f32 -1.442695, %v691_v13 }
 0xe72   :  { %937 = vpow2.f32 %v837_v14 }
 0xe78   :  { %v938_v15 = vpop.eup %937 }
 0xe79   :  { %v695_v17 = vadd.f32 1.0, %v938_v15 }
 0xe7b   :  { %939 = vrcp.f32 %v695_v17  ;;  %v707_v19 = vand.u32 2147483648, %v695_v17  ;;  %v705_v31 = vand.u32 2147483647, %v695_v17  ;;  %vm701_vm14 = vweird.f32 %v695_v17 }
 0xe7d   :  { %v708_v36 = vor.u32 1.1754944e-38, %v707_v19  ;;  %vm706_vm0 = vcmp.eq.f32.partialorder %v705_v31, 8.507059e+37 }
 0xe81   :  { %v940_v27 = vpop.eup %939 }
 0xe82   :  { %v697_v26 = vmul.f32 %v940_v27, %v695_v17  ;;  %vm702_vm13 = vweird.f32 %v940_v27 }
 0xe83   :  { %vm703_vm15 = vmor %vm701_vm14, %vm702_vm13 }
 0xe84   :  { %v698_v18 = vsub.f32 1.0, %v697_v26 }
 0xe86   :  { %v699_v20 = vmul.f32 %v940_v27, %v698_v18 }
 0xe88   :  { %v700_v21 = vadd.f32 %v940_v27, %v699_v20 }
 0xe8a   :  { %v704_v5 = vsel %vm703_vm15, %v940_v27, %v700_v21 }
 0xe8b   :  { %v709_v3 = vsel %vm706_vm0, %v708_v36, %v704_v5 }
 0xe8c   :  { %v711_v42 = vmul.f32 2.0, %v709_v3  ;;  %v716_v25 = vmul.f32 %v714_v4, %v709_v3 }
 0xe8e   :  { %v838_v22 = vadd.f32 -1.0, %v711_v42 }
 0xe90   :  { %718 = vrot.lane.b32.xlu2 %v838_v22, %s952_s23 }
 0xeea   :  { %v719_v23 = vpop.permute.xlu2 %718 }
 0xeeb   :  { %v721_v24 = vmul.f32 %v719_v23, %v709_v3 }
 0xeed   :  { %723 = vrot.lane.b32.xlu0 %v721_v24, %s953_s26 }
 0xf5f   :  { %v724_v28 = vpop.permute.xlu0 %723 }
 0xf60   :  { %v726_v29 = vadd.f32 %v724_v28, %v716_v25 }
 0xf62   :  { %941 = vtanh.f32 %v726_v29 }
 0xf68   :  { %v942_v30 = vpop.eup %941 }
 0xf69   :  { %729 = vrot.lane.b32.xlu1 %v942_v30, %s954_s27 }
 0xfdb   :  { %v730_v33 = vpop.permute.xlu1 %729 }
 0xfdc   :  { %v732_v34 = vmul.f32 %v730_v33, %v709_v3 }
 0xfde   :  { %v736_v35 = vperm.slane %v732_v34, 7 }
 0xfe0   :  { %v737_v37 = vsel %vm733_vm4, %v736_v35, %v659_v57 }
 0xfe1   :  { %742 = vrot.lane.b32.xlu2 %v737_v37, %s959_s29 }
 0xfe9   :  { %805 = vrot.lane.b32.xlu2 %v732_v34, %s959_s29 }
0x103b   :  { %v743_v38 = vpop.permute.xlu2 %742 }
0x103c   :  { %840 = vmatmul.msk.f32.vlgmr.msra.gmra.mxu2 %vm83_vm3, %v743_v38 }
0x1043   :  { %v806_v39 = vpop.permute.xlu2 %805 }
0x1044   :  { %809 = vst.msk [vmem:[%s1215_s4 + $0x1] sm:$0x80] %vm808_vm6, %v806_v39 }
0x10bf   :  { %v766_v40 = vpop.f32.mrf.mxu2 }
0x10c0   :  { %v767_v41 = vadd.f32 %v894_v51, %v766_v40 }
0x10c2   :  { %770 = vrot.lane.b32.xlu0 %v767_v41, %s960_s9 }
0x10ca   :  { %811 = vrot.lane.b32.xlu0 %v726_v29, %s961_s0 }
0x1134   :  { %v771_v16 = vpop.permute.xlu0 %770 }
0x1135   :  { %v773_v43 = vsub.f32 %v767_v41, %v771_v16 }
0x1137   :  { %v841_v44 = vmul.f32 -1.442695, %v773_v43 }
0x1139   :  { %943 = vpow2.f32 %v841_v44 }
0x113c   :  { %v812_v45 = vpop.permute.xlu0 %811 }
0x113d   :  { %814 = vst.msk [vmem:[%s1215_s4 + $0x2] sm:$0x80] %vm808_vm6, %v812_v45 }
0x113f   :  { %v944_v46 = vpop.eup %943 }
0x1140   :  { %v777_v47 = vadd.f32 1.0, %v944_v46 }
0x1142   :  { %945 = vrcp.f32 %v777_v47  ;;  %v789_v52 = vand.u32 2147483648, %v777_v47  ;;  %v787_v54 = vand.u32 2147483647, %v777_v47  ;;  %vm783_vm3 = vweird.f32 %v777_v47 }
0x1144   :  { %v790_v56 = vor.u32 1.1754944e-38, %v789_v52  ;;  %vm788_vm8 = vcmp.eq.f32.partialorder %v787_v54, 8.507059e+37 }
0x1148   :  { %v946_v48 = vpop.eup %945 }
0x1149   :  { %v779_v49 = vmul.f32 %v946_v48, %v777_v47  ;;  %vm784_vm2 = vweird.f32 %v946_v48 }
0x114a   :  { %vm785_vm7 = vmor %vm783_vm3, %vm784_vm2 }
0x114b   :  { %v780_v50 = vsub.f32 1.0, %v779_v49 }
0x114d   :  { %v781_v53 = vmul.f32 %v946_v48, %v780_v50 }
0x114f   :  { %v782_v55 = vadd.f32 %v946_v48, %v781_v53 }
0x1151   :  { %v786_v57 = vsel %vm785_vm7, %v946_v48, %v782_v55 }
0x1152   :  { %v791_v58 = vsel %vm788_vm8, %v790_v56, %v786_v57 }
0x1153   :  { %v793_v59 = vsub.f32 1.0, %v791_v58 }
0x1155   :  { %795 = vrot.lane.b32.xlu1 %v793_v59, %s962_s3 }
0x11c7   :  { %v796_v60 = vpop.permute.xlu1 %795 }
0x11c8   :  { %v799_v61 = vsel %vm798_vm9, %v791_v58, %v796_v60 }
0x11c9   :  { %803 = vst.msk [vmem:[%s1215_s4] sm:$0xff] %vm52_vm1, %v799_v61 }

</bundles_post_ra>
